<compile_context>
chip_gen: v7x
topology: tpu7x:2x2x1
jax: 0.10.0
libtpu: 0.0.40
codegen_flags: <defaults>
</compile_context>

<pallas_src>
import functools
import math

import jax
import jax.numpy as jnp
from jax.experimental import pallas as pl
from jax.experimental.pallas import tpu as pltpu  # noqa: F401  (kept for parity)

# ----------------------------- small ViT config -----------------------------
BATCH = 2
CHANNELS = 3          # pixel_values channels (RGB, like ViT)
IMG = 16
PATCH = 8
HIDDEN = 32           # stand-in for 768/1024 of the real checkpoint
HEADS = 4
HEAD_DIM = HIDDEN // HEADS
MLP = 64
LAYERS = 2
EPS = 1e-12           # HF ViT layer_norm_eps
NUM_PATCHES = (IMG // PATCH) ** 2
SEQ = NUM_PATCHES + 1  # + CLS token
S_PAD = 8              # sequence padded to one sublane tile per batch element
OUT_PAD = 128          # lane-dense fused classifier output width
FLAG = 2               # flag==2 -> both 'logits_dice' and 'logits_hd'

assert SEQ <= S_PAD


# ------------------------------ fused Pallas kernel ---------------------------
def _vit_fused_kernel(
    # inputs (19 refs)
    patches_ref, addend_ref, pw_ref,
    ln1g_ref, ln1b_ref, wqkv_ref, bqkv_ref, wo_ref, bo_ref,
    ln2g_ref, ln2b_ref, w1_ref, b1_ref, w2_ref, b2_ref,
    lnfg_ref, lnfb_ref, hw_ref, hb_ref,
    # output
    out_ref,
    *, batch, seq_pad, seq, hidden, heads, head_dim, layers):

  def _ln(x, g, b):
    mu = jnp.mean(x, axis=-1, keepdims=True)
    xc = x - mu
    var = jnp.mean(xc * xc, axis=-1, keepdims=True)
    return xc * jax.lax.rsqrt(var + EPS) * g + b

  # ---- patch embedding + CLS token + position embeddings --------------------
  # patches_ref rows for CLS slots / padding are zero; their content (CLS token,
  # position embeddings, patch-projection bias) is folded into addend_ref.
  h = (jnp.dot(patches_ref[...], pw_ref[...],
               preferred_element_type=jnp.float32)
       + addend_ref[...])                                    # (B*S_PAD, D)
  # (embedding dropout is identity at inference)

  # Additive key mask: padded key columns (>= seq) get -1e9 before softmax.
  kpos = jax.lax.broadcasted_iota(jnp.int32, (1, seq_pad), 1)
  key_bias = jnp.where(kpos < seq, 0.0, -1e9).astype(jnp.float32)  # (1, S_PAD)

  scale = 1.0 / math.sqrt(head_dim)

  for l in range(layers):   # static unroll; all layer weights VMEM-resident
    # ---- attention block: LN1 -> fused QKV -> per-head SDPA -> one out-proj --
    ln1 = _ln(h, ln1g_ref[l], ln1b_ref[l])
    qkv = (jnp.dot(ln1, wqkv_ref[l], preferred_element_type=jnp.float32)
           + bqkv_ref[l])                                    # (B*S_PAD, 3D)

    ctx_heads = []
    for hh in range(heads):   # static unroll; 3-D (single-batch-dim) einsums
      o = hh * head_dim
      q_h = qkv[:, o:o + head_dim].reshape(batch, seq_pad, head_dim)
      k_h = qkv[:, hidden + o:hidden + o + head_dim].reshape(
          batch, seq_pad, head_dim)
      v_h = qkv[:, 2 * hidden + o:2 * hidden + o + head_dim].reshape(
          batch, seq_pad, head_dim)
      s = (jnp.einsum("bqd,bkd->bqk", q_h, k_h,
                      preferred_element_type=jnp.float32) * scale
           + key_bias)                                       # (B, S_PAD, S_PAD)
      s = s - jnp.max(s, axis=-1, keepdims=True)
      p = jnp.exp(s)
      p = p / jnp.sum(p, axis=-1, keepdims=True)
      ctx_heads.append(jnp.einsum("bqk,bkd->bqd", p, v_h,
                                  preferred_element_type=jnp.float32))
    ctx = jnp.concatenate(ctx_heads, axis=-1).reshape(batch * seq_pad, hidden)
    h = (jnp.dot(ctx, wo_ref[l], preferred_element_type=jnp.float32)
         + bo_ref[l] + h)                                    # residual

    # ---- MLP block: LN2 -> fc1 + GELU -> fc2 -> residual ---------------------
    ln2 = _ln(h, ln2g_ref[l], ln2b_ref[l])
    inter = (jnp.dot(ln2, w1_ref[l], preferred_element_type=jnp.float32)
             + b1_ref[l])
    # TODO(synk): HF ViT uses the exact erf-based GELU; tanh approximation used
    # inside the kernel since erf lowering is not guaranteed in Mosaic.
    inter = jax.nn.gelu(inter, approximate=True)
    h = (jnp.dot(inter, w2_ref[l], preferred_element_type=jnp.float32)
         + b2_ref[l] + h)                                    # residual

  # ---- final LN on CLS rows + fused (lane-padded) classifier heads ----------
  cls_rows = jnp.concatenate(
      [h[b * seq_pad:b * seq_pad + 1, :] for b in range(batch)], axis=0)  # (B,D)
  cls_ln = _ln(cls_rows, lnfg_ref[...], lnfb_ref[...])
  out_ref[...] = (jnp.dot(cls_ln, hw_ref[...],
                          preferred_element_type=jnp.float32) + hb_ref[...])


# ------------------------------ model forward --------------------------------
def vit_forward(x, params, flag=FLAG):
  """x: (B, C, H, W) float32 (NCHW, PyTorch layout)."""
  B, C, H, W = x.shape
  hn, wn = H // PATCH, W // PATCH
  n_patches = hn * wn

  # Patch extraction: Conv2d(kernel=stride=PATCH) == per-patch linear projection.
  # (c, ph, pw) flattening order matches torch Conv2d weight.reshape(D, C*p*p).
  patch_dim = C * PATCH * PATCH
  patches = (x.reshape(B, C, hn, PATCH, wn, PATCH)
              .transpose(0, 2, 4, 1, 3, 5)
              .reshape(B, n_patches, patch_dim))
  # Scatter into a sublane-aligned padded slab: row 0 of each batch block is the
  # CLS slot (zeros), rows 1..n_patches are the patches, rest is padding.
  patches_pad = jnp.zeros((B, S_PAD, patch_dim), jnp.float32)
  patches_pad = patches_pad.at[:, 1:1 + n_patches, :].set(patches)
  patches_pad = patches_pad.reshape(B * S_PAD, patch_dim)

  # Weight-only additive slab: CLS token + position embeddings + patch-proj bias
  # folded into a single aligned add inside the kernel (constant folding).
  addend = jnp.zeros((S_PAD, HIDDEN), jnp.float32)
  addend = addend.at[0, :].set(params["cls"][0] + params["pos"][0])
  addend = addend.at[1:1 + n_patches, :].set(
      params["patch_b"] + params["pos"][1:1 + n_patches])
  addend_full = jnp.tile(addend, (B, 1))                     # (B*S_PAD, D)

  # Fused, lane-padded classifier heads (column 0 = dice, column 1 = hd).
  head_w = jnp.zeros((HIDDEN, OUT_PAD), jnp.float32).at[:, 0:1].set(
      params["cls_w"])
  head_b = jnp.zeros((1, OUT_PAD), jnp.float32).at[:, 0:1].set(params["cls_b"])
  if flag != 1:
    head_w = head_w.at[:, 1:2].set(params["hd_w"])
    head_b = head_b.at[:, 1:2].set(params["hd_b"])

  kernel = functools.partial(
      _vit_fused_kernel, batch=B, seq_pad=S_PAD, seq=n_patches + 1,
      hidden=HIDDEN, heads=HEADS, head_dim=HEAD_DIM, layers=LAYERS)

  # No grid: everything (activations + all per-layer weights, a few tens of KB)
  # fits comfortably in VMEM on every TPU generation; whole arrays are passed as
  # VMEM-resident refs (default BlockSpecs).
  logits = pl.pallas_call(
      kernel,
      out_shape=jax.ShapeDtypeStruct((B, OUT_PAD), jnp.float32),
  )(patches_pad, addend_full, params["patch_w"],
    params["ln1_g"], params["ln1_b"], params["wqkv"], params["bqkv"],
    params["wo"], params["bo"], params["ln2_g"], params["ln2_b"],
    params["w1"], params["b1"], params["w2"], params["b2"],
    params["ln_g"], params["ln_b"], head_w, head_b)

  logits_dice = logits[:, 0:1]
  if flag == 1:
    return {"logits_dice": logits_dice}
  logits_hd = logits[:, 1:2]
  return {"logits_dice": logits_dice, "logits_hd": logits_hd}


# ------------------------------ parameter init --------------------------------
def init_params(key):
  ks = jax.random.split(key, 10)
  patch_dim = CHANNELS * PATCH * PATCH
  p = {}
  p["patch_w"] = jax.random.normal(ks[0], (patch_dim, HIDDEN), jnp.float32) * 0.02
  p["patch_b"] = jnp.zeros((1, HIDDEN), jnp.float32)
  p["cls"] = jax.random.normal(ks[1], (1, HIDDEN), jnp.float32) * 0.02
  p["pos"] = jax.random.normal(ks[2], (SEQ, HIDDEN), jnp.float32) * 0.02
  # stacked per-layer encoder weights (leading axis = layer)
  p["ln1_g"] = jnp.ones((LAYERS, 1, HIDDEN), jnp.float32)
  p["ln1_b"] = jnp.zeros((LAYERS, 1, HIDDEN), jnp.float32)
  p["wqkv"] = jax.random.normal(ks[3], (LAYERS, HIDDEN, 3 * HIDDEN),
                                jnp.float32) * 0.02
  p["bqkv"] = jnp.zeros((LAYERS, 1, 3 * HIDDEN), jnp.float32)
  p["wo"] = jax.random.normal(ks[4], (LAYERS, HIDDEN, HIDDEN), jnp.float32) * 0.02
  p["bo"] = jnp.zeros((LAYERS, 1, HIDDEN), jnp.float32)
  p["ln2_g"] = jnp.ones((LAYERS, 1, HIDDEN), jnp.float32)
  p["ln2_b"] = jnp.zeros((LAYERS, 1, HIDDEN), jnp.float32)
  p["w1"] = jax.random.normal(ks[5], (LAYERS, HIDDEN, MLP), jnp.float32) * 0.02
  p["b1"] = jnp.zeros((LAYERS, 1, MLP), jnp.float32)
  p["w2"] = jax.random.normal(ks[6], (LAYERS, MLP, HIDDEN), jnp.float32) * 0.02
  p["b2"] = jnp.zeros((LAYERS, 1, HIDDEN), jnp.float32)
  # final ViTModel LayerNorm + the two classifier heads
  p["ln_g"] = jnp.ones((1, HIDDEN), jnp.float32)
  p["ln_b"] = jnp.zeros((1, HIDDEN), jnp.float32)
  p["cls_w"] = jax.random.normal(ks[7], (HIDDEN, 1), jnp.float32) * 0.02
  p["cls_b"] = jnp.zeros((1, 1), jnp.float32)
  p["hd_w"] = jax.random.normal(ks[8], (HIDDEN, 1), jnp.float32) * 0.02
  p["hd_b"] = jnp.zeros((1, 1), jnp.float32)
  return p


# ----------------------------------- main -------------------------------------
if __name__ == "__main__":
  key = jax.random.PRNGKey(0)
  kx, kp = jax.random.split(key)
  x = jax.random.normal(kx, (BATCH, CHANNELS, IMG, IMG), jnp.float32)
  params = init_params(kp)

  fwd = jax.jit(functools.partial(vit_forward, flag=FLAG))
  out = jax.block_until_ready(fwd(x, params))

  assert out["logits_dice"].shape == (BATCH, 1)
  assert out["logits_hd"].shape == (BATCH, 1)
  assert bool(jnp.all(jnp.isfinite(out["logits_dice"])))
  assert bool(jnp.all(jnp.isfinite(out["logits_hd"])))
  print("KERNEL_OK")
</pallas_src>

<mosaic_0001>
module attributes {stable_mosaic.version = 11 : i64} {
  func.func @_vit_fused_kernel(%arg0: memref<16x192xf32, #tpu.memory_space<vmem>>, %arg1: memref<16x32xf32, #tpu.memory_space<vmem>>, %arg2: memref<192x32xf32, #tpu.memory_space<vmem>>, %arg3: memref<2x1x32xf32, #tpu.memory_space<vmem>>, %arg4: memref<2x1x32xf32, #tpu.memory_space<vmem>>, %arg5: memref<2x32x96xf32, #tpu.memory_space<vmem>>, %arg6: memref<2x1x96xf32, #tpu.memory_space<vmem>>, %arg7: memref<2x32x32xf32, #tpu.memory_space<vmem>>, %arg8: memref<2x1x32xf32, #tpu.memory_space<vmem>>, %arg9: memref<2x1x32xf32, #tpu.memory_space<vmem>>, %arg10: memref<2x1x32xf32, #tpu.memory_space<vmem>>, %arg11: memref<2x32x64xf32, #tpu.memory_space<vmem>>, %arg12: memref<2x1x64xf32, #tpu.memory_space<vmem>>, %arg13: memref<2x64x32xf32, #tpu.memory_space<vmem>>, %arg14: memref<2x1x32xf32, #tpu.memory_space<vmem>>, %arg15: memref<1x32xf32, #tpu.memory_space<vmem>>, %arg16: memref<1x32xf32, #tpu.memory_space<vmem>>, %arg17: memref<32x128xf32, #tpu.memory_space<vmem>>, %arg18: memref<1x128xf32, #tpu.memory_space<vmem>>, %arg19: memref<2x128xf32, #tpu.memory_space<vmem>>) attributes {dimension_semantics = [], scalar_prefetch = 0 : i64, scratch_operands = 0 : i64, tpu.core_type = #tpu.core_type<tc>} {
    %c0 = arith.constant 0 : index
    %c0_0 = arith.constant 0 : index
    %0 = vector.load %arg0[%c0, %c0_0] : memref<16x192xf32, #tpu.memory_space<vmem>>, vector<16x192xf32>
    %c0_1 = arith.constant 0 : index
    %c0_2 = arith.constant 0 : index
    %1 = vector.load %arg2[%c0_1, %c0_2] : memref<192x32xf32, #tpu.memory_space<vmem>>, vector<192x32xf32>
    %cst = arith.constant dense<0.000000e+00> : vector<16x32xf32>
    %2 = tpu.matmul %0, %1, %cst {dimension_numbers = #tpu.dot_dimension_numbers<[1], [0], [0], [1], [0, 0, 1, 1], [], []>} : vector<16x192xf32>, vector<192x32xf32>, vector<16x32xf32> -> vector<16x32xf32>
    %c0_3 = arith.constant 0 : index
    %c0_4 = arith.constant 0 : index
    %3 = vector.load %arg1[%c0_3, %c0_4] : memref<16x32xf32, #tpu.memory_space<vmem>>, vector<16x32xf32>
    %4 = arith.addf %2, %3 : vector<16x32xf32>
    %5 = tpu.iota {dimensions = array<i32: 1>} : vector<1x8xi32>
    %c5_i32 = arith.constant 5 : i32
    %6 = vector.broadcast %c5_i32 : i32 to vector<1x8xi32>
    %7 = arith.cmpi slt, %5, %6 : vector<1x8xi32>
    %cst_5 = arith.constant 0.000000e+00 : f32
    %cst_6 = arith.constant -1.000000e+09 : f32
    %8 = vector.broadcast %cst_5 : f32 to vector<1x8xf32>
    %9 = vector.broadcast %cst_6 : f32 to vector<1x8xf32>
    %10 = arith.select %7, %8, %9 : vector<1x8xi1>, vector<1x8xf32>
    %c0_7 = arith.constant 0 : index
    %c0_8 = arith.constant 0 : index
    %c0_9 = arith.constant 0 : index
    %11 = vector.load %arg3[%c0_7, %c0_8, %c0_9] : memref<2x1x32xf32, #tpu.memory_space<vmem>>, vector<1x1x32xf32>
    %12 = vector.shape_cast %11 : vector<1x1x32xf32> to vector<1x32xf32>
    %c0_10 = arith.constant 0 : index
    %c0_11 = arith.constant 0 : index
    %c0_12 = arith.constant 0 : index
    %13 = vector.load %arg4[%c0_10, %c0_11, %c0_12] : memref<2x1x32xf32, #tpu.memory_space<vmem>>, vector<1x1x32xf32>
    %14 = vector.shape_cast %13 : vector<1x1x32xf32> to vector<1x32xf32>
    %cst_13 = arith.constant dense<0.000000e+00> : vector<16xf32>
    %15 = vector.multi_reduction <add>, %4, %cst_13 [1] : vector<16x32xf32> to vector<16xf32>
    %16 = vector.shape_cast %15 : vector<16xf32> to vector<16x1xf32>
    %cst_14 = arith.constant 3.200000e+01 : f32
    %17 = vector.broadcast %cst_14 : f32 to vector<16x1xf32>
    %18 = arith.divf %16, %17 : vector<16x1xf32>
    %19 = vector.broadcast %18 : vector<16x1xf32> to vector<16x32xf32>
    %20 = arith.subf %4, %19 : vector<16x32xf32>
    %21 = arith.mulf %20, %20 : vector<16x32xf32>
    %cst_15 = arith.constant dense<0.000000e+00> : vector<16xf32>
    %22 = vector.multi_reduction <add>, %21, %cst_15 [1] : vector<16x32xf32> to vector<16xf32>
    %23 = vector.shape_cast %22 : vector<16xf32> to vector<16x1xf32>
    %cst_16 = arith.constant 3.200000e+01 : f32
    %24 = vector.broadcast %cst_16 : f32 to vector<16x1xf32>
    %25 = arith.divf %23, %24 : vector<16x1xf32>
    %cst_17 = arith.constant 9.99999996E-13 : f32
    %26 = vector.broadcast %cst_17 : f32 to vector<16x1xf32>
    %27 = arith.addf %25, %26 : vector<16x1xf32>
    %28 = math.rsqrt %27 : vector<16x1xf32>
    %29 = vector.broadcast %28 : vector<16x1xf32> to vector<16x32xf32>
    %30 = arith.mulf %20, %29 : vector<16x32xf32>
    %31 = vector.broadcast %12 : vector<1x32xf32> to vector<16x32xf32>
    %32 = arith.mulf %30, %31 : vector<16x32xf32>
    %33 = vector.broadcast %14 : vector<1x32xf32> to vector<16x32xf32>
    %34 = arith.addf %32, %33 : vector<16x32xf32>
    %c0_18 = arith.constant 0 : index
    %c0_19 = arith.constant 0 : index
    %c0_20 = arith.constant 0 : index
    %35 = vector.load %arg5[%c0_18, %c0_19, %c0_20] : memref<2x32x96xf32, #tpu.memory_space<vmem>>, vector<1x32x96xf32>
    %36 = vector.shape_cast %35 : vector<1x32x96xf32> to vector<32x96xf32>
    %cst_21 = arith.constant dense<0.000000e+00> : vector<16x96xf32>
    %37 = tpu.matmul %34, %36, %cst_21 {dimension_numbers = #tpu.dot_dimension_numbers<[1], [0], [0], [1], [0, 0, 1, 1], [], []>} : vector<16x32xf32>, vector<32x96xf32>, vector<16x96xf32> -> vector<16x96xf32>
    %c0_22 = arith.constant 0 : index
    %c0_23 = arith.constant 0 : index
    %c0_24 = arith.constant 0 : index
    %38 = vector.load %arg6[%c0_22, %c0_23, %c0_24] : memref<2x1x96xf32, #tpu.memory_space<vmem>>, vector<1x1x96xf32>
    %39 = vector.shape_cast %38 : vector<1x1x96xf32> to vector<1x96xf32>
    %40 = vector.broadcast %39 : vector<1x96xf32> to vector<16x96xf32>
    %41 = arith.addf %37, %40 : vector<16x96xf32>
    %42 = vector.extract_strided_slice %41 {offsets = [0, 0], sizes = [16, 8], strides = [1, 1]} : vector<16x96xf32> to vector<16x8xf32>
    %43 = vector.shape_cast %42 : vector<16x8xf32> to vector<2x8x8xf32>
    %44 = vector.extract_strided_slice %41 {offsets = [0, 32], sizes = [16, 8], strides = [1, 1]} : vector<16x96xf32> to vector<16x8xf32>
    %45 = vector.shape_cast %44 : vector<16x8xf32> to vector<2x8x8xf32>
    %46 = vector.extract_strided_slice %41 {offsets = [0, 64], sizes = [16, 8], strides = [1, 1]} : vector<16x96xf32> to vector<16x8xf32>
    %47 = vector.shape_cast %46 : vector<16x8xf32> to vector<2x8x8xf32>
    "tpu.trace_start"() <{level = 10 : i32, message = "bqd,bkd->bqk"}> : () -> ()
    %cst_25 = arith.constant dense<0.000000e+00> : vector<2x8x8xf32>
    %48 = tpu.matmul %43, %45, %cst_25 {dimension_numbers = #tpu.dot_dimension_numbers<[2], [2], [1], [1], [0, 0, 0, 1, 1, 1], [0], [0]>} : vector<2x8x8xf32>, vector<2x8x8xf32>, vector<2x8x8xf32> -> vector<2x8x8xf32>
    "tpu.trace_stop"() : () -> ()
    %cst_26 = arith.constant 0.353553385 : f32
    %49 = vector.broadcast %cst_26 : f32 to vector<2x8x8xf32>
    %50 = arith.mulf %48, %49 : vector<2x8x8xf32>
    %51 = vector.shape_cast %10 : vector<1x8xf32> to vector<1x1x8xf32>
    %52 = vector.broadcast %51 : vector<1x1x8xf32> to vector<2x8x8xf32>
    %53 = arith.addf %50, %52 : vector<2x8x8xf32>
    %cst_27 = arith.constant dense<0xFF800000> : vector<2x8xf32>
    %54 = vector.multi_reduction <maximumf>, %53, %cst_27 [2] : vector<2x8x8xf32> to vector<2x8xf32>
    %55 = vector.shape_cast %54 : vector<2x8xf32> to vector<2x8x1xf32>
    %56 = vector.broadcast %55 : vector<2x8x1xf32> to vector<2x8x8xf32>
    %57 = arith.subf %53, %56 : vector<2x8x8xf32>
    %58 = math.exp %57 : vector<2x8x8xf32>
    %cst_28 = arith.constant dense<0.000000e+00> : vector<2x8xf32>
    %59 = vector.multi_reduction <add>, %58, %cst_28 [2] : vector<2x8x8xf32> to vector<2x8xf32>
    %60 = vector.shape_cast %59 : vector<2x8xf32> to vector<2x8x1xf32>
    %61 = vector.broadcast %60 : vector<2x8x1xf32> to vector<2x8x8xf32>
    %62 = arith.divf %58, %61 : vector<2x8x8xf32>
    "tpu.trace_start"() <{level = 10 : i32, message = "bqk,bkd->bqd"}> : () -> ()
    %cst_29 = arith.constant dense<0.000000e+00> : vector<2x8x8xf32>
    %63 = tpu.matmul %62, %47, %cst_29 {dimension_numbers = #tpu.dot_dimension_numbers<[2], [1], [1], [2], [0, 0, 0, 1, 1, 2], [0], [0]>} : vector<2x8x8xf32>, vector<2x8x8xf32>, vector<2x8x8xf32> -> vector<2x8x8xf32>
    "tpu.trace_stop"() : () -> ()
    %64 = vector.extract_strided_slice %41 {offsets = [0, 8], sizes = [16, 8], strides = [1, 1]} : vector<16x96xf32> to vector<16x8xf32>
    %65 = vector.shape_cast %64 : vector<16x8xf32> to vector<2x8x8xf32>
    %66 = vector.extract_strided_slice %41 {offsets = [0, 40], sizes = [16, 8], strides = [1, 1]} : vector<16x96xf32> to vector<16x8xf32>
    %67 = vector.shape_cast %66 : vector<16x8xf32> to vector<2x8x8xf32>
    %68 = vector.extract_strided_slice %41 {offsets = [0, 72], sizes = [16, 8], strides = [1, 1]} : vector<16x96xf32> to vector<16x8xf32>
    %69 = vector.shape_cast %68 : vector<16x8xf32> to vector<2x8x8xf32>
    "tpu.trace_start"() <{level = 10 : i32, message = "bqd,bkd->bqk"}> : () -> ()
    %cst_30 = arith.constant dense<0.000000e+00> : vector<2x8x8xf32>
    %70 = tpu.matmul %65, %67, %cst_30 {dimension_numbers = #tpu.dot_dimension_numbers<[2], [2], [1], [1], [0, 0, 0, 1, 1, 1], [0], [0]>} : vector<2x8x8xf32>, vector<2x8x8xf32>, vector<2x8x8xf32> -> vector<2x8x8xf32>
    "tpu.trace_stop"() : () -> ()
    %cst_31 = arith.constant 0.353553385 : f32
    %71 = vector.broadcast %cst_31 : f32 to vector<2x8x8xf32>
    %72 = arith.mulf %70, %71 : vector<2x8x8xf32>
    %73 = vector.shape_cast %10 : vector<1x8xf32> to vector<1x1x8xf32>
    %74 = vector.broadcast %73 : vector<1x1x8xf32> to vector<2x8x8xf32>
    %75 = arith.addf %72, %74 : vector<2x8x8xf32>
    %cst_32 = arith.constant dense<0xFF800000> : vector<2x8xf32>
    %76 = vector.multi_reduction <maximumf>, %75, %cst_32 [2] : vector<2x8x8xf32> to vector<2x8xf32>
    %77 = vector.shape_cast %76 : vector<2x8xf32> to vector<2x8x1xf32>
    %78 = vector.broadcast %77 : vector<2x8x1xf32> to vector<2x8x8xf32>
    %79 = arith.subf %75, %78 : vector<2x8x8xf32>
    %80 = math.exp %79 : vector<2x8x8xf32>
    %cst_33 = arith.constant dense<0.000000e+00> : vector<2x8xf32>
    %81 = vector.multi_reduction <add>, %80, %cst_33 [2] : vector<2x8x8xf32> to vector<2x8xf32>
    %82 = vector.shape_cast %81 : vector<2x8xf32> to vector<2x8x1xf32>
    %83 = vector.broadcast %82 : vector<2x8x1xf32> to vector<2x8x8xf32>
    %84 = arith.divf %80, %83 : vector<2x8x8xf32>
    "tpu.trace_start"() <{level = 10 : i32, message = "bqk,bkd->bqd"}> : () -> ()
    %cst_34 = arith.constant dense<0.000000e+00> : vector<2x8x8xf32>
    %85 = tpu.matmul %84, %69, %cst_34 {dimension_numbers = #tpu.dot_dimension_numbers<[2], [1], [1], [2], [0, 0, 0, 1, 1, 2], [0], [0]>} : vector<2x8x8xf32>, vector<2x8x8xf32>, vector<2x8x8xf32> -> vector<2x8x8xf32>
    "tpu.trace_stop"() : () -> ()
    %86 = vector.extract_strided_slice %41 {offsets = [0, 16], sizes = [16, 8], strides = [1, 1]} : vector<16x96xf32> to vector<16x8xf32>
    %87 = vector.shape_cast %86 : vector<16x8xf32> to vector<2x8x8xf32>
    %88 = vector.extract_strided_slice %41 {offsets = [0, 48], sizes = [16, 8], strides = [1, 1]} : vector<16x96xf32> to vector<16x8xf32>
    %89 = vector.shape_cast %88 : vector<16x8xf32> to vector<2x8x8xf32>
    %90 = vector.extract_strided_slice %41 {offsets = [0, 80], sizes = [16, 8], strides = [1, 1]} : vector<16x96xf32> to vector<16x8xf32>
    %91 = vector.shape_cast %90 : vector<16x8xf32> to vector<2x8x8xf32>
    "tpu.trace_start"() <{level = 10 : i32, message = "bqd,bkd->bqk"}> : () -> ()
    %cst_35 = arith.constant dense<0.000000e+00> : vector<2x8x8xf32>
    %92 = tpu.matmul %87, %89, %cst_35 {dimension_numbers = #tpu.dot_dimension_numbers<[2], [2], [1], [1], [0, 0, 0, 1, 1, 1], [0], [0]>} : vector<2x8x8xf32>, vector<2x8x8xf32>, vector<2x8x8xf32> -> vector<2x8x8xf32>
    "tpu.trace_stop"() : () -> ()
    %cst_36 = arith.constant 0.353553385 : f32
    %93 = vector.broadcast %cst_36 : f32 to vector<2x8x8xf32>
    %94 = arith.mulf %92, %93 : vector<2x8x8xf32>
    %95 = vector.shape_cast %10 : vector<1x8xf32> to vector<1x1x8xf32>
    %96 = vector.broadcast %95 : vector<1x1x8xf32> to vector<2x8x8xf32>
    %97 = arith.addf %94, %96 : vector<2x8x8xf32>
    %cst_37 = arith.constant dense<0xFF800000> : vector<2x8xf32>
    %98 = vector.multi_reduction <maximumf>, %97, %cst_37 [2] : vector<2x8x8xf32> to vector<2x8xf32>
    %99 = vector.shape_cast %98 : vector<2x8xf32> to vector<2x8x1xf32>
    %100 = vector.broadcast %99 : vector<2x8x1xf32> to vector<2x8x8xf32>
    %101 = arith.subf %97, %100 : vector<2x8x8xf32>
    %102 = math.exp %101 : vector<2x8x8xf32>
    %cst_38 = arith.constant dense<0.000000e+00> : vector<2x8xf32>
    %103 = vector.multi_reduction <add>, %102, %cst_38 [2] : vector<2x8x8xf32> to vector<2x8xf32>
    %104 = vector.shape_cast %103 : vector<2x8xf32> to vector<2x8x1xf32>
    %105 = vector.broadcast %104 : vector<2x8x1xf32> to vector<2x8x8xf32>
    %106 = arith.divf %102, %105 : vector<2x8x8xf32>
    "tpu.trace_start"() <{level = 10 : i32, message = "bqk,bkd->bqd"}> : () -> ()
    %cst_39 = arith.constant dense<0.000000e+00> : vector<2x8x8xf32>
    %107 = tpu.matmul %106, %91, %cst_39 {dimension_numbers = #tpu.dot_dimension_numbers<[2], [1], [1], [2], [0, 0, 0, 1, 1, 2], [0], [0]>} : vector<2x8x8xf32>, vector<2x8x8xf32>, vector<2x8x8xf32> -> vector<2x8x8xf32>
    "tpu.trace_stop"() : () -> ()
    %108 = vector.extract_strided_slice %41 {offsets = [0, 24], sizes = [16, 8], strides = [1, 1]} : vector<16x96xf32> to vector<16x8xf32>
    %109 = vector.shape_cast %108 : vector<16x8xf32> to vector<2x8x8xf32>
    %110 = vector.extract_strided_slice %41 {offsets = [0, 56], sizes = [16, 8], strides = [1, 1]} : vector<16x96xf32> to vector<16x8xf32>
    %111 = vector.shape_cast %110 : vector<16x8xf32> to vector<2x8x8xf32>
    %112 = vector.extract_strided_slice %41 {offsets = [0, 88], sizes = [16, 8], strides = [1, 1]} : vector<16x96xf32> to vector<16x8xf32>
    %113 = vector.shape_cast %112 : vector<16x8xf32> to vector<2x8x8xf32>
    "tpu.trace_start"() <{level = 10 : i32, message = "bqd,bkd->bqk"}> : () -> ()
    %cst_40 = arith.constant dense<0.000000e+00> : vector<2x8x8xf32>
    %114 = tpu.matmul %109, %111, %cst_40 {dimension_numbers = #tpu.dot_dimension_numbers<[2], [2], [1], [1], [0, 0, 0, 1, 1, 1], [0], [0]>} : vector<2x8x8xf32>, vector<2x8x8xf32>, vector<2x8x8xf32> -> vector<2x8x8xf32>
    "tpu.trace_stop"() : () -> ()
    %cst_41 = arith.constant 0.353553385 : f32
    %115 = vector.broadcast %cst_41 : f32 to vector<2x8x8xf32>
    %116 = arith.mulf %114, %115 : vector<2x8x8xf32>
    %117 = vector.shape_cast %10 : vector<1x8xf32> to vector<1x1x8xf32>
    %118 = vector.broadcast %117 : vector<1x1x8xf32> to vector<2x8x8xf32>
    %119 = arith.addf %116, %118 : vector<2x8x8xf32>
    %cst_42 = arith.constant dense<0xFF800000> : vector<2x8xf32>
    %120 = vector.multi_reduction <maximumf>, %119, %cst_42 [2] : vector<2x8x8xf32> to vector<2x8xf32>
    %121 = vector.shape_cast %120 : vector<2x8xf32> to vector<2x8x1xf32>
    %122 = vector.broadcast %121 : vector<2x8x1xf32> to vector<2x8x8xf32>
    %123 = arith.subf %119, %122 : vector<2x8x8xf32>
    %124 = math.exp %123 : vector<2x8x8xf32>
    %cst_43 = arith.constant dense<0.000000e+00> : vector<2x8xf32>
    %125 = vector.multi_reduction <add>, %124, %cst_43 [2] : vector<2x8x8xf32> to vector<2x8xf32>
    %126 = vector.shape_cast %125 : vector<2x8xf32> to vector<2x8x1xf32>
    %127 = vector.broadcast %126 : vector<2x8x1xf32> to vector<2x8x8xf32>
    %128 = arith.divf %124, %127 : vector<2x8x8xf32>
    "tpu.trace_start"() <{level = 10 : i32, message = "bqk,bkd->bqd"}> : () -> ()
    %cst_44 = arith.constant dense<0.000000e+00> : vector<2x8x8xf32>
    %129 = tpu.matmul %128, %113, %cst_44 {dimension_numbers = #tpu.dot_dimension_numbers<[2], [1], [1], [2], [0, 0, 0, 1, 1, 2], [0], [0]>} : vector<2x8x8xf32>, vector<2x8x8xf32>, vector<2x8x8xf32> -> vector<2x8x8xf32>
    "tpu.trace_stop"() : () -> ()
    %130 = tpu.concatenate %63, %85, %107, %129 in 2 : vector<2x8x8xf32>, vector<2x8x8xf32>, vector<2x8x8xf32>, vector<2x8x8xf32> -> vector<2x8x32xf32>
    %131 = vector.shape_cast %130 : vector<2x8x32xf32> to vector<16x32xf32>
    %c0_45 = arith.constant 0 : index
    %c0_46 = arith.constant 0 : index
    %c0_47 = arith.constant 0 : index
    %132 = vector.load %arg7[%c0_45, %c0_46, %c0_47] : memref<2x32x32xf32, #tpu.memory_space<vmem>>, vector<1x32x32xf32>
    %133 = vector.shape_cast %132 : vector<1x32x32xf32> to vector<32x32xf32>
    %cst_48 = arith.constant dense<0.000000e+00> : vector<16x32xf32>
    %134 = tpu.matmul %131, %133, %cst_48 {dimension_numbers = #tpu.dot_dimension_numbers<[1], [0], [0], [1], [0, 0, 1, 1], [], []>} : vector<16x32xf32>, vector<32x32xf32>, vector<16x32xf32> -> vector<16x32xf32>
    %c0_49 = arith.constant 0 : index
    %c0_50 = arith.constant 0 : index
    %c0_51 = arith.constant 0 : index
    %135 = vector.load %arg8[%c0_49, %c0_50, %c0_51] : memref<2x1x32xf32, #tpu.memory_space<vmem>>, vector<1x1x32xf32>
    %136 = vector.shape_cast %135 : vector<1x1x32xf32> to vector<1x32xf32>
    %137 = vector.broadcast %136 : vector<1x32xf32> to vector<16x32xf32>
    %138 = arith.addf %134, %137 : vector<16x32xf32>
    %139 = arith.addf %138, %4 : vector<16x32xf32>
    %c0_52 = arith.constant 0 : index
    %c0_53 = arith.constant 0 : index
    %c0_54 = arith.constant 0 : index
    %140 = vector.load %arg9[%c0_52, %c0_53, %c0_54] : memref<2x1x32xf32, #tpu.memory_space<vmem>>, vector<1x1x32xf32>
    %141 = vector.shape_cast %140 : vector<1x1x32xf32> to vector<1x32xf32>
    %c0_55 = arith.constant 0 : index
    %c0_56 = arith.constant 0 : index
    %c0_57 = arith.constant 0 : index
    %142 = vector.load %arg10[%c0_55, %c0_56, %c0_57] : memref<2x1x32xf32, #tpu.memory_space<vmem>>, vector<1x1x32xf32>
    %143 = vector.shape_cast %142 : vector<1x1x32xf32> to vector<1x32xf32>
    %cst_58 = arith.constant dense<0.000000e+00> : vector<16xf32>
    %144 = vector.multi_reduction <add>, %139, %cst_58 [1] : vector<16x32xf32> to vector<16xf32>
    %145 = vector.shape_cast %144 : vector<16xf32> to vector<16x1xf32>
    %cst_59 = arith.constant 3.200000e+01 : f32
    %146 = vector.broadcast %cst_59 : f32 to vector<16x1xf32>
    %147 = arith.divf %145, %146 : vector<16x1xf32>
    %148 = vector.broadcast %147 : vector<16x1xf32> to vector<16x32xf32>
    %149 = arith.subf %139, %148 : vector<16x32xf32>
    %150 = arith.mulf %149, %149 : vector<16x32xf32>
    %cst_60 = arith.constant dense<0.000000e+00> : vector<16xf32>
    %151 = vector.multi_reduction <add>, %150, %cst_60 [1] : vector<16x32xf32> to vector<16xf32>
    %152 = vector.shape_cast %151 : vector<16xf32> to vector<16x1xf32>
    %cst_61 = arith.constant 3.200000e+01 : f32
    %153 = vector.broadcast %cst_61 : f32 to vector<16x1xf32>
    %154 = arith.divf %152, %153 : vector<16x1xf32>
    %cst_62 = arith.constant 9.99999996E-13 : f32
    %155 = vector.broadcast %cst_62 : f32 to vector<16x1xf32>
    %156 = arith.addf %154, %155 : vector<16x1xf32>
    %157 = math.rsqrt %156 : vector<16x1xf32>
    %158 = vector.broadcast %157 : vector<16x1xf32> to vector<16x32xf32>
    %159 = arith.mulf %149, %158 : vector<16x32xf32>
    %160 = vector.broadcast %141 : vector<1x32xf32> to vector<16x32xf32>
    %161 = arith.mulf %159, %160 : vector<16x32xf32>
    %162 = vector.broadcast %143 : vector<1x32xf32> to vector<16x32xf32>
    %163 = arith.addf %161, %162 : vector<16x32xf32>
    %c0_63 = arith.constant 0 : index
    %c0_64 = arith.constant 0 : index
    %c0_65 = arith.constant 0 : index
    %164 = vector.load %arg11[%c0_63, %c0_64, %c0_65] : memref<2x32x64xf32, #tpu.memory_space<vmem>>, vector<1x32x64xf32>
    %165 = vector.shape_cast %164 : vector<1x32x64xf32> to vector<32x64xf32>
    %cst_66 = arith.constant dense<0.000000e+00> : vector<16x64xf32>
    %166 = tpu.matmul %163, %165, %cst_66 {dimension_numbers = #tpu.dot_dimension_numbers<[1], [0], [0], [1], [0, 0, 1, 1], [], []>} : vector<16x32xf32>, vector<32x64xf32>, vector<16x64xf32> -> vector<16x64xf32>
    %c0_67 = arith.constant 0 : index
    %c0_68 = arith.constant 0 : index
    %c0_69 = arith.constant 0 : index
    %167 = vector.load %arg12[%c0_67, %c0_68, %c0_69] : memref<2x1x64xf32, #tpu.memory_space<vmem>>, vector<1x1x64xf32>
    %168 = vector.shape_cast %167 : vector<1x1x64xf32> to vector<1x64xf32>
    %169 = vector.broadcast %168 : vector<1x64xf32> to vector<16x64xf32>
    %170 = arith.addf %166, %169 : vector<16x64xf32>
    %171 = arith.mulf %170, %170 : vector<16x64xf32>
    %172 = arith.mulf %170, %171 : vector<16x64xf32>
    %cst_70 = arith.constant 4.471500e-02 : f32
    %173 = vector.broadcast %cst_70 : f32 to vector<16x64xf32>
    %174 = arith.mulf %173, %172 : vector<16x64xf32>
    %175 = arith.addf %170, %174 : vector<16x64xf32>
    %cst_71 = arith.constant 0.797884583 : f32
    %176 = vector.broadcast %cst_71 : f32 to vector<16x64xf32>
    %177 = arith.mulf %176, %175 : vector<16x64xf32>
    %178 = math.tanh %177 : vector<16x64xf32>
    %cst_72 = arith.constant 1.000000e+00 : f32
    %179 = vector.broadcast %cst_72 : f32 to vector<16x64xf32>
    %180 = arith.addf %179, %178 : vector<16x64xf32>
    %cst_73 = arith.constant 5.000000e-01 : f32
    %181 = vector.broadcast %cst_73 : f32 to vector<16x64xf32>
    %182 = arith.mulf %181, %180 : vector<16x64xf32>
    %183 = arith.mulf %170, %182 : vector<16x64xf32>
    %c0_74 = arith.constant 0 : index
    %c0_75 = arith.constant 0 : index
    %c0_76 = arith.constant 0 : index
    %184 = vector.load %arg13[%c0_74, %c0_75, %c0_76] : memref<2x64x32xf32, #tpu.memory_space<vmem>>, vector<1x64x32xf32>
    %185 = vector.shape_cast %184 : vector<1x64x32xf32> to vector<64x32xf32>
    %cst_77 = arith.constant dense<0.000000e+00> : vector<16x32xf32>
    %186 = tpu.matmul %183, %185, %cst_77 {dimension_numbers = #tpu.dot_dimension_numbers<[1], [0], [0], [1], [0, 0, 1, 1], [], []>} : vector<16x64xf32>, vector<64x32xf32>, vector<16x32xf32> -> vector<16x32xf32>
    %c0_78 = arith.constant 0 : index
    %c0_79 = arith.constant 0 : index
    %c0_80 = arith.constant 0 : index
    %187 = vector.load %arg14[%c0_78, %c0_79, %c0_80] : memref<2x1x32xf32, #tpu.memory_space<vmem>>, vector<1x1x32xf32>
    %188 = vector.shape_cast %187 : vector<1x1x32xf32> to vector<1x32xf32>
    %189 = vector.broadcast %188 : vector<1x32xf32> to vector<16x32xf32>
    %190 = arith.addf %186, %189 : vector<16x32xf32>
    %191 = arith.addf %190, %139 : vector<16x32xf32>
    %c1 = arith.constant 1 : index
    %c0_81 = arith.constant 0 : index
    %c0_82 = arith.constant 0 : index
    %192 = vector.load %arg3[%c1, %c0_81, %c0_82] : memref<2x1x32xf32, #tpu.memory_space<vmem>>, vector<1x1x32xf32>
    %193 = vector.shape_cast %192 : vector<1x1x32xf32> to vector<1x32xf32>
    %c1_83 = arith.constant 1 : index
    %c0_84 = arith.constant 0 : index
    %c0_85 = arith.constant 0 : index
    %194 = vector.load %arg4[%c1_83, %c0_84, %c0_85] : memref<2x1x32xf32, #tpu.memory_space<vmem>>, vector<1x1x32xf32>
    %195 = vector.shape_cast %194 : vector<1x1x32xf32> to vector<1x32xf32>
    %cst_86 = arith.constant dense<0.000000e+00> : vector<16xf32>
    %196 = vector.multi_reduction <add>, %191, %cst_86 [1] : vector<16x32xf32> to vector<16xf32>
    %197 = vector.shape_cast %196 : vector<16xf32> to vector<16x1xf32>
    %cst_87 = arith.constant 3.200000e+01 : f32
    %198 = vector.broadcast %cst_87 : f32 to vector<16x1xf32>
    %199 = arith.divf %197, %198 : vector<16x1xf32>
    %200 = vector.broadcast %199 : vector<16x1xf32> to vector<16x32xf32>
    %201 = arith.subf %191, %200 : vector<16x32xf32>
    %202 = arith.mulf %201, %201 : vector<16x32xf32>
    %cst_88 = arith.constant dense<0.000000e+00> : vector<16xf32>
    %203 = vector.multi_reduction <add>, %202, %cst_88 [1] : vector<16x32xf32> to vector<16xf32>
    %204 = vector.shape_cast %203 : vector<16xf32> to vector<16x1xf32>
    %cst_89 = arith.constant 3.200000e+01 : f32
    %205 = vector.broadcast %cst_89 : f32 to vector<16x1xf32>
    %206 = arith.divf %204, %205 : vector<16x1xf32>
    %cst_90 = arith.constant 9.99999996E-13 : f32
    %207 = vector.broadcast %cst_90 : f32 to vector<16x1xf32>
    %208 = arith.addf %206, %207 : vector<16x1xf32>
    %209 = math.rsqrt %208 : vector<16x1xf32>
    %210 = vector.broadcast %209 : vector<16x1xf32> to vector<16x32xf32>
    %211 = arith.mulf %201, %210 : vector<16x32xf32>
    %212 = vector.broadcast %193 : vector<1x32xf32> to vector<16x32xf32>
    %213 = arith.mulf %211, %212 : vector<16x32xf32>
    %214 = vector.broadcast %195 : vector<1x32xf32> to vector<16x32xf32>
    %215 = arith.addf %213, %214 : vector<16x32xf32>
    %c1_91 = arith.constant 1 : index
    %c0_92 = arith.constant 0 : index
    %c0_93 = arith.constant 0 : index
    %216 = vector.load %arg5[%c1_91, %c0_92, %c0_93] : memref<2x32x96xf32, #tpu.memory_space<vmem>>, vector<1x32x96xf32>
    %217 = vector.shape_cast %216 : vector<1x32x96xf32> to vector<32x96xf32>
    %cst_94 = arith.constant dense<0.000000e+00> : vector<16x96xf32>
    %218 = tpu.matmul %215, %217, %cst_94 {dimension_numbers = #tpu.dot_dimension_numbers<[1], [0], [0], [1], [0, 0, 1, 1], [], []>} : vector<16x32xf32>, vector<32x96xf32>, vector<16x96xf32> -> vector<16x96xf32>
    %c1_95 = arith.constant 1 : index
    %c0_96 = arith.constant 0 : index
    %c0_97 = arith.constant 0 : index
    %219 = vector.load %arg6[%c1_95, %c0_96, %c0_97] : memref<2x1x96xf32, #tpu.memory_space<vmem>>, vector<1x1x96xf32>
    %220 = vector.shape_cast %219 : vector<1x1x96xf32> to vector<1x96xf32>
    %221 = vector.broadcast %220 : vector<1x96xf32> to vector<16x96xf32>
    %222 = arith.addf %218, %221 : vector<16x96xf32>
    %223 = vector.extract_strided_slice %222 {offsets = [0, 0], sizes = [16, 8], strides = [1, 1]} : vector<16x96xf32> to vector<16x8xf32>
    %224 = vector.shape_cast %223 : vector<16x8xf32> to vector<2x8x8xf32>
    %225 = vector.extract_strided_slice %222 {offsets = [0, 32], sizes = [16, 8], strides = [1, 1]} : vector<16x96xf32> to vector<16x8xf32>
    %226 = vector.shape_cast %225 : vector<16x8xf32> to vector<2x8x8xf32>
    %227 = vector.extract_strided_slice %222 {offsets = [0, 64], sizes = [16, 8], strides = [1, 1]} : vector<16x96xf32> to vector<16x8xf32>
    %228 = vector.shape_cast %227 : vector<16x8xf32> to vector<2x8x8xf32>
    "tpu.trace_start"() <{level = 10 : i32, message = "bqd,bkd->bqk"}> : () -> ()
    %cst_98 = arith.constant dense<0.000000e+00> : vector<2x8x8xf32>
    %229 = tpu.matmul %224, %226, %cst_98 {dimension_numbers = #tpu.dot_dimension_numbers<[2], [2], [1], [1], [0, 0, 0, 1, 1, 1], [0], [0]>} : vector<2x8x8xf32>, vector<2x8x8xf32>, vector<2x8x8xf32> -> vector<2x8x8xf32>
    "tpu.trace_stop"() : () -> ()
    %cst_99 = arith.constant 0.353553385 : f32
    %230 = vector.broadcast %cst_99 : f32 to vector<2x8x8xf32>
    %231 = arith.mulf %229, %230 : vector<2x8x8xf32>
    %232 = vector.shape_cast %10 : vector<1x8xf32> to vector<1x1x8xf32>
    %233 = vector.broadcast %232 : vector<1x1x8xf32> to vector<2x8x8xf32>
    %234 = arith.addf %231, %233 : vector<2x8x8xf32>
    %cst_100 = arith.constant dense<0xFF800000> : vector<2x8xf32>
    %235 = vector.multi_reduction <maximumf>, %234, %cst_100 [2] : vector<2x8x8xf32> to vector<2x8xf32>
    %236 = vector.shape_cast %235 : vector<2x8xf32> to vector<2x8x1xf32>
    %237 = vector.broadcast %236 : vector<2x8x1xf32> to vector<2x8x8xf32>
    %238 = arith.subf %234, %237 : vector<2x8x8xf32>
    %239 = math.exp %238 : vector<2x8x8xf32>
    %cst_101 = arith.constant dense<0.000000e+00> : vector<2x8xf32>
    %240 = vector.multi_reduction <add>, %239, %cst_101 [2] : vector<2x8x8xf32> to vector<2x8xf32>
    %241 = vector.shape_cast %240 : vector<2x8xf32> to vector<2x8x1xf32>
    %242 = vector.broadcast %241 : vector<2x8x1xf32> to vector<2x8x8xf32>
    %243 = arith.divf %239, %242 : vector<2x8x8xf32>
    "tpu.trace_start"() <{level = 10 : i32, message = "bqk,bkd->bqd"}> : () -> ()
    %cst_102 = arith.constant dense<0.000000e+00> : vector<2x8x8xf32>
    %244 = tpu.matmul %243, %228, %cst_102 {dimension_numbers = #tpu.dot_dimension_numbers<[2], [1], [1], [2], [0, 0, 0, 1, 1, 2], [0], [0]>} : vector<2x8x8xf32>, vector<2x8x8xf32>, vector<2x8x8xf32> -> vector<2x8x8xf32>
    "tpu.trace_stop"() : () -> ()
    %245 = vector.extract_strided_slice %222 {offsets = [0, 8], sizes = [16, 8], strides = [1, 1]} : vector<16x96xf32> to vector<16x8xf32>
    %246 = vector.shape_cast %245 : vector<16x8xf32> to vector<2x8x8xf32>
    %247 = vector.extract_strided_slice %222 {offsets = [0, 40], sizes = [16, 8], strides = [1, 1]} : vector<16x96xf32> to vector<16x8xf32>
    %248 = vector.shape_cast %247 : vector<16x8xf32> to vector<2x8x8xf32>
    %249 = vector.extract_strided_slice %222 {offsets = [0, 72], sizes = [16, 8], strides = [1, 1]} : vector<16x96xf32> to vector<16x8xf32>
    %250 = vector.shape_cast %249 : vector<16x8xf32> to vector<2x8x8xf32>
    "tpu.trace_start"() <{level = 10 : i32, message = "bqd,bkd->bqk"}> : () -> ()
    %cst_103 = arith.constant dense<0.000000e+00> : vector<2x8x8xf32>
    %251 = tpu.matmul %246, %248, %cst_103 {dimension_numbers = #tpu.dot_dimension_numbers<[2], [2], [1], [1], [0, 0, 0, 1, 1, 1], [0], [0]>} : vector<2x8x8xf32>, vector<2x8x8xf32>, vector<2x8x8xf32> -> vector<2x8x8xf32>
    "tpu.trace_stop"() : () -> ()
    %cst_104 = arith.constant 0.353553385 : f32
    %252 = vector.broadcast %cst_104 : f32 to vector<2x8x8xf32>
    %253 = arith.mulf %251, %252 : vector<2x8x8xf32>
    %254 = vector.shape_cast %10 : vector<1x8xf32> to vector<1x1x8xf32>
    %255 = vector.broadcast %254 : vector<1x1x8xf32> to vector<2x8x8xf32>
    %256 = arith.addf %253, %255 : vector<2x8x8xf32>
    %cst_105 = arith.constant dense<0xFF800000> : vector<2x8xf32>
    %257 = vector.multi_reduction <maximumf>, %256, %cst_105 [2] : vector<2x8x8xf32> to vector<2x8xf32>
    %258 = vector.shape_cast %257 : vector<2x8xf32> to vector<2x8x1xf32>
    %259 = vector.broadcast %258 : vector<2x8x1xf32> to vector<2x8x8xf32>
    %260 = arith.subf %256, %259 : vector<2x8x8xf32>
    %261 = math.exp %260 : vector<2x8x8xf32>
    %cst_106 = arith.constant dense<0.000000e+00> : vector<2x8xf32>
    %262 = vector.multi_reduction <add>, %261, %cst_106 [2] : vector<2x8x8xf32> to vector<2x8xf32>
    %263 = vector.shape_cast %262 : vector<2x8xf32> to vector<2x8x1xf32>
    %264 = vector.broadcast %263 : vector<2x8x1xf32> to vector<2x8x8xf32>
    %265 = arith.divf %261, %264 : vector<2x8x8xf32>
    "tpu.trace_start"() <{level = 10 : i32, message = "bqk,bkd->bqd"}> : () -> ()
    %cst_107 = arith.constant dense<0.000000e+00> : vector<2x8x8xf32>
    %266 = tpu.matmul %265, %250, %cst_107 {dimension_numbers = #tpu.dot_dimension_numbers<[2], [1], [1], [2], [0, 0, 0, 1, 1, 2], [0], [0]>} : vector<2x8x8xf32>, vector<2x8x8xf32>, vector<2x8x8xf32> -> vector<2x8x8xf32>
    "tpu.trace_stop"() : () -> ()
    %267 = vector.extract_strided_slice %222 {offsets = [0, 16], sizes = [16, 8], strides = [1, 1]} : vector<16x96xf32> to vector<16x8xf32>
    %268 = vector.shape_cast %267 : vector<16x8xf32> to vector<2x8x8xf32>
    %269 = vector.extract_strided_slice %222 {offsets = [0, 48], sizes = [16, 8], strides = [1, 1]} : vector<16x96xf32> to vector<16x8xf32>
    %270 = vector.shape_cast %269 : vector<16x8xf32> to vector<2x8x8xf32>
    %271 = vector.extract_strided_slice %222 {offsets = [0, 80], sizes = [16, 8], strides = [1, 1]} : vector<16x96xf32> to vector<16x8xf32>
    %272 = vector.shape_cast %271 : vector<16x8xf32> to vector<2x8x8xf32>
    "tpu.trace_start"() <{level = 10 : i32, message = "bqd,bkd->bqk"}> : () -> ()
    %cst_108 = arith.constant dense<0.000000e+00> : vector<2x8x8xf32>
    %273 = tpu.matmul %268, %270, %cst_108 {dimension_numbers = #tpu.dot_dimension_numbers<[2], [2], [1], [1], [0, 0, 0, 1, 1, 1], [0], [0]>} : vector<2x8x8xf32>, vector<2x8x8xf32>, vector<2x8x8xf32> -> vector<2x8x8xf32>
    "tpu.trace_stop"() : () -> ()
    %cst_109 = arith.constant 0.353553385 : f32
    %274 = vector.broadcast %cst_109 : f32 to vector<2x8x8xf32>
    %275 = arith.mulf %273, %274 : vector<2x8x8xf32>
    %276 = vector.shape_cast %10 : vector<1x8xf32> to vector<1x1x8xf32>
    %277 = vector.broadcast %276 : vector<1x1x8xf32> to vector<2x8x8xf32>
    %278 = arith.addf %275, %277 : vector<2x8x8xf32>
    %cst_110 = arith.constant dense<0xFF800000> : vector<2x8xf32>
    %279 = vector.multi_reduction <maximumf>, %278, %cst_110 [2] : vector<2x8x8xf32> to vector<2x8xf32>
    %280 = vector.shape_cast %279 : vector<2x8xf32> to vector<2x8x1xf32>
    %281 = vector.broadcast %280 : vector<2x8x1xf32> to vector<2x8x8xf32>
    %282 = arith.subf %278, %281 : vector<2x8x8xf32>
    %283 = math.exp %282 : vector<2x8x8xf32>
    %cst_111 = arith.constant dense<0.000000e+00> : vector<2x8xf32>
    %284 = vector.multi_reduction <add>, %283, %cst_111 [2] : vector<2x8x8xf32> to vector<2x8xf32>
    %285 = vector.shape_cast %284 : vector<2x8xf32> to vector<2x8x1xf32>
    %286 = vector.broadcast %285 : vector<2x8x1xf32> to vector<2x8x8xf32>
    %287 = arith.divf %283, %286 : vector<2x8x8xf32>
    "tpu.trace_start"() <{level = 10 : i32, message = "bqk,bkd->bqd"}> : () -> ()
    %cst_112 = arith.constant dense<0.000000e+00> : vector<2x8x8xf32>
    %288 = tpu.matmul %287, %272, %cst_112 {dimension_numbers = #tpu.dot_dimension_numbers<[2], [1], [1], [2], [0, 0, 0, 1, 1, 2], [0], [0]>} : vector<2x8x8xf32>, vector<2x8x8xf32>, vector<2x8x8xf32> -> vector<2x8x8xf32>
    "tpu.trace_stop"() : () -> ()
    %289 = vector.extract_strided_slice %222 {offsets = [0, 24], sizes = [16, 8], strides = [1, 1]} : vector<16x96xf32> to vector<16x8xf32>
    %290 = vector.shape_cast %289 : vector<16x8xf32> to vector<2x8x8xf32>
    %291 = vector.extract_strided_slice %222 {offsets = [0, 56], sizes = [16, 8], strides = [1, 1]} : vector<16x96xf32> to vector<16x8xf32>
    %292 = vector.shape_cast %291 : vector<16x8xf32> to vector<2x8x8xf32>
    %293 = vector.extract_strided_slice %222 {offsets = [0, 88], sizes = [16, 8], strides = [1, 1]} : vector<16x96xf32> to vector<16x8xf32>
    %294 = vector.shape_cast %293 : vector<16x8xf32> to vector<2x8x8xf32>
    "tpu.trace_start"() <{level = 10 : i32, message = "bqd,bkd->bqk"}> : () -> ()
    %cst_113 = arith.constant dense<0.000000e+00> : vector<2x8x8xf32>
    %295 = tpu.matmul %290, %292, %cst_113 {dimension_numbers = #tpu.dot_dimension_numbers<[2], [2], [1], [1], [0, 0, 0, 1, 1, 1], [0], [0]>} : vector<2x8x8xf32>, vector<2x8x8xf32>, vector<2x8x8xf32> -> vector<2x8x8xf32>
    "tpu.trace_stop"() : () -> ()
    %cst_114 = arith.constant 0.353553385 : f32
    %296 = vector.broadcast %cst_114 : f32 to vector<2x8x8xf32>
    %297 = arith.mulf %295, %296 : vector<2x8x8xf32>
    %298 = vector.shape_cast %10 : vector<1x8xf32> to vector<1x1x8xf32>
    %299 = vector.broadcast %298 : vector<1x1x8xf32> to vector<2x8x8xf32>
    %300 = arith.addf %297, %299 : vector<2x8x8xf32>
    %cst_115 = arith.constant dense<0xFF800000> : vector<2x8xf32>
    %301 = vector.multi_reduction <maximumf>, %300, %cst_115 [2] : vector<2x8x8xf32> to vector<2x8xf32>
    %302 = vector.shape_cast %301 : vector<2x8xf32> to vector<2x8x1xf32>
    %303 = vector.broadcast %302 : vector<2x8x1xf32> to vector<2x8x8xf32>
    %304 = arith.subf %300, %303 : vector<2x8x8xf32>
    %305 = math.exp %304 : vector<2x8x8xf32>
    %cst_116 = arith.constant dense<0.000000e+00> : vector<2x8xf32>
    %306 = vector.multi_reduction <add>, %305, %cst_116 [2] : vector<2x8x8xf32> to vector<2x8xf32>
    %307 = vector.shape_cast %306 : vector<2x8xf32> to vector<2x8x1xf32>
    %308 = vector.broadcast %307 : vector<2x8x1xf32> to vector<2x8x8xf32>
    %309 = arith.divf %305, %308 : vector<2x8x8xf32>
    "tpu.trace_start"() <{level = 10 : i32, message = "bqk,bkd->bqd"}> : () -> ()
    %cst_117 = arith.constant dense<0.000000e+00> : vector<2x8x8xf32>
    %310 = tpu.matmul %309, %294, %cst_117 {dimension_numbers = #tpu.dot_dimension_numbers<[2], [1], [1], [2], [0, 0, 0, 1, 1, 2], [0], [0]>} : vector<2x8x8xf32>, vector<2x8x8xf32>, vector<2x8x8xf32> -> vector<2x8x8xf32>
    "tpu.trace_stop"() : () -> ()
    %311 = tpu.concatenate %244, %266, %288, %310 in 2 : vector<2x8x8xf32>, vector<2x8x8xf32>, vector<2x8x8xf32>, vector<2x8x8xf32> -> vector<2x8x32xf32>
    %312 = vector.shape_cast %311 : vector<2x8x32xf32> to vector<16x32xf32>
    %c1_118 = arith.constant 1 : index
    %c0_119 = arith.constant 0 : index
    %c0_120 = arith.constant 0 : index
    %313 = vector.load %arg7[%c1_118, %c0_119, %c0_120] : memref<2x32x32xf32, #tpu.memory_space<vmem>>, vector<1x32x32xf32>
    %314 = vector.shape_cast %313 : vector<1x32x32xf32> to vector<32x32xf32>
    %cst_121 = arith.constant dense<0.000000e+00> : vector<16x32xf32>
    %315 = tpu.matmul %312, %314, %cst_121 {dimension_numbers = #tpu.dot_dimension_numbers<[1], [0], [0], [1], [0, 0, 1, 1], [], []>} : vector<16x32xf32>, vector<32x32xf32>, vector<16x32xf32> -> vector<16x32xf32>
    %c1_122 = arith.constant 1 : index
    %c0_123 = arith.constant 0 : index
    %c0_124 = arith.constant 0 : index
    %316 = vector.load %arg8[%c1_122, %c0_123, %c0_124] : memref<2x1x32xf32, #tpu.memory_space<vmem>>, vector<1x1x32xf32>
    %317 = vector.shape_cast %316 : vector<1x1x32xf32> to vector<1x32xf32>
    %318 = vector.broadcast %317 : vector<1x32xf32> to vector<16x32xf32>
    %319 = arith.addf %315, %318 : vector<16x32xf32>
    %320 = arith.addf %319, %191 : vector<16x32xf32>
    %c1_125 = arith.constant 1 : index
    %c0_126 = arith.constant 0 : index
    %c0_127 = arith.constant 0 : index
    %321 = vector.load %arg9[%c1_125, %c0_126, %c0_127] : memref<2x1x32xf32, #tpu.memory_space<vmem>>, vector<1x1x32xf32>
    %322 = vector.shape_cast %321 : vector<1x1x32xf32> to vector<1x32xf32>
    %c1_128 = arith.constant 1 : index
    %c0_129 = arith.constant 0 : index
    %c0_130 = arith.constant 0 : index
    %323 = vector.load %arg10[%c1_128, %c0_129, %c0_130] : memref<2x1x32xf32, #tpu.memory_space<vmem>>, vector<1x1x32xf32>
    %324 = vector.shape_cast %323 : vector<1x1x32xf32> to vector<1x32xf32>
    %cst_131 = arith.constant dense<0.000000e+00> : vector<16xf32>
    %325 = vector.multi_reduction <add>, %320, %cst_131 [1] : vector<16x32xf32> to vector<16xf32>
    %326 = vector.shape_cast %325 : vector<16xf32> to vector<16x1xf32>
    %cst_132 = arith.constant 3.200000e+01 : f32
    %327 = vector.broadcast %cst_132 : f32 to vector<16x1xf32>
    %328 = arith.divf %326, %327 : vector<16x1xf32>
    %329 = vector.broadcast %328 : vector<16x1xf32> to vector<16x32xf32>
    %330 = arith.subf %320, %329 : vector<16x32xf32>
    %331 = arith.mulf %330, %330 : vector<16x32xf32>
    %cst_133 = arith.constant dense<0.000000e+00> : vector<16xf32>
    %332 = vector.multi_reduction <add>, %331, %cst_133 [1] : vector<16x32xf32> to vector<16xf32>
    %333 = vector.shape_cast %332 : vector<16xf32> to vector<16x1xf32>
    %cst_134 = arith.constant 3.200000e+01 : f32
    %334 = vector.broadcast %cst_134 : f32 to vector<16x1xf32>
    %335 = arith.divf %333, %334 : vector<16x1xf32>
    %cst_135 = arith.constant 9.99999996E-13 : f32
    %336 = vector.broadcast %cst_135 : f32 to vector<16x1xf32>
    %337 = arith.addf %335, %336 : vector<16x1xf32>
    %338 = math.rsqrt %337 : vector<16x1xf32>
    %339 = vector.broadcast %338 : vector<16x1xf32> to vector<16x32xf32>
    %340 = arith.mulf %330, %339 : vector<16x32xf32>
    %341 = vector.broadcast %322 : vector<1x32xf32> to vector<16x32xf32>
    %342 = arith.mulf %340, %341 : vector<16x32xf32>
    %343 = vector.broadcast %324 : vector<1x32xf32> to vector<16x32xf32>
    %344 = arith.addf %342, %343 : vector<16x32xf32>
    %c1_136 = arith.constant 1 : index
    %c0_137 = arith.constant 0 : index
    %c0_138 = arith.constant 0 : index
    %345 = vector.load %arg11[%c1_136, %c0_137, %c0_138] : memref<2x32x64xf32, #tpu.memory_space<vmem>>, vector<1x32x64xf32>
    %346 = vector.shape_cast %345 : vector<1x32x64xf32> to vector<32x64xf32>
    %cst_139 = arith.constant dense<0.000000e+00> : vector<16x64xf32>
    %347 = tpu.matmul %344, %346, %cst_139 {dimension_numbers = #tpu.dot_dimension_numbers<[1], [0], [0], [1], [0, 0, 1, 1], [], []>} : vector<16x32xf32>, vector<32x64xf32>, vector<16x64xf32> -> vector<16x64xf32>
    %c1_140 = arith.constant 1 : index
    %c0_141 = arith.constant 0 : index
    %c0_142 = arith.constant 0 : index
    %348 = vector.load %arg12[%c1_140, %c0_141, %c0_142] : memref<2x1x64xf32, #tpu.memory_space<vmem>>, vector<1x1x64xf32>
    %349 = vector.shape_cast %348 : vector<1x1x64xf32> to vector<1x64xf32>
    %350 = vector.broadcast %349 : vector<1x64xf32> to vector<16x64xf32>
    %351 = arith.addf %347, %350 : vector<16x64xf32>
    %352 = arith.mulf %351, %351 : vector<16x64xf32>
    %353 = arith.mulf %351, %352 : vector<16x64xf32>
    %cst_143 = arith.constant 4.471500e-02 : f32
    %354 = vector.broadcast %cst_143 : f32 to vector<16x64xf32>
    %355 = arith.mulf %354, %353 : vector<16x64xf32>
    %356 = arith.addf %351, %355 : vector<16x64xf32>
    %cst_144 = arith.constant 0.797884583 : f32
    %357 = vector.broadcast %cst_144 : f32 to vector<16x64xf32>
    %358 = arith.mulf %357, %356 : vector<16x64xf32>
    %359 = math.tanh %358 : vector<16x64xf32>
    %cst_145 = arith.constant 1.000000e+00 : f32
    %360 = vector.broadcast %cst_145 : f32 to vector<16x64xf32>
    %361 = arith.addf %360, %359 : vector<16x64xf32>
    %cst_146 = arith.constant 5.000000e-01 : f32
    %362 = vector.broadcast %cst_146 : f32 to vector<16x64xf32>
    %363 = arith.mulf %362, %361 : vector<16x64xf32>
    %364 = arith.mulf %351, %363 : vector<16x64xf32>
    %c1_147 = arith.constant 1 : index
    %c0_148 = arith.constant 0 : index
    %c0_149 = arith.constant 0 : index
    %365 = vector.load %arg13[%c1_147, %c0_148, %c0_149] : memref<2x64x32xf32, #tpu.memory_space<vmem>>, vector<1x64x32xf32>
    %366 = vector.shape_cast %365 : vector<1x64x32xf32> to vector<64x32xf32>
    %cst_150 = arith.constant dense<0.000000e+00> : vector<16x32xf32>
    %367 = tpu.matmul %364, %366, %cst_150 {dimension_numbers = #tpu.dot_dimension_numbers<[1], [0], [0], [1], [0, 0, 1, 1], [], []>} : vector<16x64xf32>, vector<64x32xf32>, vector<16x32xf32> -> vector<16x32xf32>
    %c1_151 = arith.constant 1 : index
    %c0_152 = arith.constant 0 : index
    %c0_153 = arith.constant 0 : index
    %368 = vector.load %arg14[%c1_151, %c0_152, %c0_153] : memref<2x1x32xf32, #tpu.memory_space<vmem>>, vector<1x1x32xf32>
    %369 = vector.shape_cast %368 : vector<1x1x32xf32> to vector<1x32xf32>
    %370 = vector.broadcast %369 : vector<1x32xf32> to vector<16x32xf32>
    %371 = arith.addf %367, %370 : vector<16x32xf32>
    %372 = arith.addf %371, %320 : vector<16x32xf32>
    %373 = vector.extract_strided_slice %372 {offsets = [0, 0], sizes = [1, 32], strides = [1, 1]} : vector<16x32xf32> to vector<1x32xf32>
    %374 = vector.extract_strided_slice %372 {offsets = [8, 0], sizes = [1, 32], strides = [1, 1]} : vector<16x32xf32> to vector<1x32xf32>
    %375 = tpu.concatenate %373, %374 in 0 : vector<1x32xf32>, vector<1x32xf32> -> vector<2x32xf32>
    %c0_154 = arith.constant 0 : index
    %c0_155 = arith.constant 0 : index
    %376 = vector.load %arg15[%c0_154, %c0_155] : memref<1x32xf32, #tpu.memory_space<vmem>>, vector<1x32xf32>
    %c0_156 = arith.constant 0 : index
    %c0_157 = arith.constant 0 : index
    %377 = vector.load %arg16[%c0_156, %c0_157] : memref<1x32xf32, #tpu.memory_space<vmem>>, vector<1x32xf32>
    %cst_158 = arith.constant dense<0.000000e+00> : vector<2xf32>
    %378 = vector.multi_reduction <add>, %375, %cst_158 [1] : vector<2x32xf32> to vector<2xf32>
    %379 = vector.shape_cast %378 : vector<2xf32> to vector<2x1xf32>
    %cst_159 = arith.constant 3.200000e+01 : f32
    %380 = vector.broadcast %cst_159 : f32 to vector<2x1xf32>
    %381 = arith.divf %379, %380 : vector<2x1xf32>
    %382 = vector.broadcast %381 : vector<2x1xf32> to vector<2x32xf32>
    %383 = arith.subf %375, %382 : vector<2x32xf32>
    %384 = arith.mulf %383, %383 : vector<2x32xf32>
    %cst_160 = arith.constant dense<0.000000e+00> : vector<2xf32>
    %385 = vector.multi_reduction <add>, %384, %cst_160 [1] : vector<2x32xf32> to vector<2xf32>
    %386 = vector.shape_cast %385 : vector<2xf32> to vector<2x1xf32>
    %cst_161 = arith.constant 3.200000e+01 : f32
    %387 = vector.broadcast %cst_161 : f32 to vector<2x1xf32>
    %388 = arith.divf %386, %387 : vector<2x1xf32>
    %cst_162 = arith.constant 9.99999996E-13 : f32
    %389 = vector.broadcast %cst_162 : f32 to vector<2x1xf32>
    %390 = arith.addf %388, %389 : vector<2x1xf32>
    %391 = math.rsqrt %390 : vector<2x1xf32>
    %392 = vector.broadcast %391 : vector<2x1xf32> to vector<2x32xf32>
    %393 = arith.mulf %383, %392 : vector<2x32xf32>
    %394 = vector.broadcast %376 : vector<1x32xf32> to vector<2x32xf32>
    %395 = arith.mulf %393, %394 : vector<2x32xf32>
    %396 = vector.broadcast %377 : vector<1x32xf32> to vector<2x32xf32>
    %397 = arith.addf %395, %396 : vector<2x32xf32>
    %c0_163 = arith.constant 0 : index
    %c0_164 = arith.constant 0 : index
    %398 = vector.load %arg17[%c0_163, %c0_164] : memref<32x128xf32, #tpu.memory_space<vmem>>, vector<32x128xf32>
    %cst_165 = arith.constant dense<0.000000e+00> : vector<2x128xf32>
    %399 = tpu.matmul %397, %398, %cst_165 {dimension_numbers = #tpu.dot_dimension_numbers<[1], [0], [0], [1], [0, 0, 1, 1], [], []>} : vector<2x32xf32>, vector<32x128xf32>, vector<2x128xf32> -> vector<2x128xf32>
    %c0_166 = arith.constant 0 : index
    %c0_167 = arith.constant 0 : index
    %400 = vector.load %arg18[%c0_166, %c0_167] : memref<1x128xf32, #tpu.memory_space<vmem>>, vector<1x128xf32>
    %401 = vector.broadcast %400 : vector<1x128xf32> to vector<2x128xf32>
    %402 = arith.addf %399, %401 : vector<2x128xf32>
    %c0_168 = arith.constant 0 : index
    %c0_169 = arith.constant 0 : index
    %403 = vector.load %arg19[%c0_168, %c0_169] : memref<2x128xf32, #tpu.memory_space<vmem>>, vector<2x128xf32>
    tpu.vector_store %arg19[%c0_168, %c0_169], %402 {strides = array<i32>} : memref<2x128xf32, #tpu.memory_space<vmem>>, vector<2x128xf32>,
    return
  }
}

</mosaic_0001>

<bundles_post_ra>
// kernel: vit_forward.1
= control target key start
LH: loop header
LB: loop body
LE: loop exit
PB: predicated region body
PF: predicated region fallthrough
CT: control target
= control target key end

     0   :  { %v4755_v0 = vmov 0.0|0.0   ;;  %vm92_vm0 = vcmask 523264   ;;  %vm180_vm1 = vcmask 261120   ;;  %vm4757_vm2 = vmmov 0   ;;  %s4760_s25 = smov 64   ;;  %s4761_s26 = smov 88   ;;  %s5588_s2 = inlined_call_operand.vmem [shape: f32[192,32], index: 2, kind: input, shape index: {}]   ;;  %s5589_s0 = inlined_call_operand.vmem [shape: f32[16,192], index: 0, kind: input, shape index: {}]   ;;  %s5590_s1 = inlined_call_operand.vmem [shape: f32[16,32], index: 1, kind: input, shape index: {}]   ;;  %s5591_s5 = inlined_call_operand.vmem [shape: f32[2,32,96], index: 5, kind: input, shape index: {}]   ;;  %s5592_s3 = inlined_call_operand.vmem [shape: f32[2,1,32], index: 3, kind: input, shape index: {}]   ;;  %s5593_s4 = inlined_call_operand.vmem [shape: f32[2,1,32], index: 4, kind: input, shape index: {}]   ;;  %s5594_s6 = inlined_call_operand.vmem [shape: f32[2,1,96], index: 6, kind: input, shape index: {}]   ;;  %s5595_s7 = inlined_call_operand.vmem [shape: f32[2,32,32], index: 7, kind: input, shape index: {}]   ;;  %s5596_s8 = inlined_call_operand.vmem [shape: f32[2,1,32], index: 8, kind: input, shape index: {}]   ;;  %s5597_s11 = inlined_call_operand.vmem [shape: f32[2,32,64], index: 11, kind: input, shape index: {}]   ;;  %s5598_s9 = inlined_call_operand.vmem [shape: f32[2,1,32], index: 9, kind: input, shape index: {}]   ;;  %s5599_s10 = inlined_call_operand.vmem [shape: f32[2,1,32], index: 10, kind: input, shape index: {}]   ;;  %s5600_s13 = inlined_call_operand.vmem [shape: f32[2,64,32], index: 13, kind: input, shape index: {}]   ;;  %s5601_s12 = inlined_call_operand.vmem [shape: f32[2,1,64], index: 12, kind: input, shape index: {}]   ;;  %s5602_s14 = inlined_call_operand.vmem [shape: f32[2,1,32], index: 14, kind: input, shape index: {}]   ;;  %s5603_s17 = inlined_call_operand.vmem [shape: f32[32,128], index: 17, kind: input, shape index: {}]   ;;  %s5604_s15 = inlined_call_operand.vmem [shape: f32[1,32], index: 15, kind: input, shape index: {}]   ;;  %s5605_s16 = inlined_call_operand.vmem [shape: f32[1,32], index: 16, kind: input, shape index: {}]   ;;  %s5606_s18 = inlined_call_operand.vmem [shape: f32[1,128], index: 18, kind: input, shape index: {}]   ;;  %s5607_s19 = inlined_call_operand.vmem [shape: f32[2,128], index: 19, kind: output, shape index: {}]  }
   0x1   :  { %5628 = sst [smem:[#allocation2_spill]] %s5588_s2  ;;  %4525 = vmatprep.subr.bf16.mxu0 %v4755_v0  ;;  %vm319_vm3 = vcmask 64512   ;;  %s4762_s27 = smov 120   ;;  %vm1680_vm5 = vcmask 195584   ;;  %vm1677_vm6 = vcmask 130048   ;;  %vm3890_vm7 = vcmask 1040384  }
   0x2   :  { %5629 = sst [smem:[#allocation3_spill]] %s5589_s0  ;;  %s5632_s20 = sld [smem:[#allocation2_spill]]  ;;  %vm3894_vm8 = vcmask 254976  }
   0x3   :  { %5630 = sst [smem:[#allocation4_spill]] %s5590_s1  ;;  %s5633_s22 = sld [smem:[#allocation3_spill]] }
   0x4   :  { %5631 = sst [smem:[#allocation5_spill]] %s5591_s5  ;;  %s5634_s1 = sld [smem:[#allocation4_spill]] }
   0x5   :  { %s5635_s5 = sld [smem:[#allocation5_spill]]  ;;  %s4763_s28 = smov 56  }
   0x6   :  { %s4764_s29 = smov 80   ;;  %s5624_s2 = smov 112  }
   0x7   :  { %s5622_s30 = smov 48   ;;  %s5620_s21 = smov 72  }
   0x8   :  { %v66_v1 = vld [vmem:[%s5632_s20] sm:$0xff]  ;;  %v67_v2 = vld [vmem:[%s5632_s20 + $0x8] sm:$0xff]  ;;  %v68_v3 = vld [vmem:[%s5632_s20 + $0x10] sm:$0xff]  ;;  %s5614_s0 = smov 40   ;;  %s5616_s23 = smov 16  }
   0x9   :  { %v4526_v4 = vpack.c.bf16 %v67_v2, %v66_v1  ;;  %v69_v5 = vld [vmem:[%s5632_s20 + $0x18] sm:$0xff]  ;;  %v70_v7 = vld [vmem:[%s5632_s20 + $0x20] sm:$0xff]  ;;  %v71_v8 = vld [vmem:[%s5632_s20 + $0x28] sm:$0xff] }
   0xa   :  { %v4529_v6 = vpack.c.bf16 %v69_v5, %v68_v3  ;;  %v4532_v9 = vpack.c.bf16 %v71_v8, %v70_v7  ;;  %v72_v10 = vld [vmem:[%s5632_s20 + $0x30] sm:$0xff]  ;;  %v73_v11 = vld [vmem:[%s5632_s20 + $0x38] sm:$0xff]  ;;  %v63_v12 = vld [vmem:[%s5633_s22 + $0x8] sm:$0xff] }
   0xb   :  { %4527 = vmatpush1.bf16.msra.mxu0 %v4526_v4  ;;  %4011 = vmatprep.mubr.msk.f32.mxu0 %vm92_vm0, %v63_v12  ;;  %v4535_v13 = vpack.c.bf16 %v73_v11, %v72_v10  ;;  %v74_v14 = vld [vmem:[%s5632_s20 + $0x40] sm:$0xff]  ;;  %v75_v15 = vld [vmem:[%s5632_s20 + $0x48] sm:$0xff]  ;;  %v76_v17 = vld [vmem:[%s5632_s20 + $0x50] sm:$0xff] }
   0xc   :  { %4528 = vmatprep.subr.bf16.mxu0 %v4755_v0  ;;  %v4538_v16 = vpack.c.bf16 %v75_v15, %v74_v14  ;;  %v77_v18 = vld [vmem:[%s5632_s20 + $0x58] sm:$0xff]  ;;  %v78_v20 = vld [vmem:[%s5632_s20 + $0x60] sm:$0xff]  ;;  %v79_v21 = vld [vmem:[%s5632_s20 + $0x68] sm:$0xff] }
   0xd   :  { %v4541_v19 = vpack.c.bf16 %v77_v18, %v76_v17  ;;  %v4544_v22 = vpack.c.bf16 %v79_v21, %v78_v20  ;;  %v80_v23 = vld [vmem:[%s5632_s20 + $0x70] sm:$0xff]  ;;  %v81_v24 = vld [vmem:[%s5632_s20 + $0x78] sm:$0xff]  ;;  %v82_v26 = vld [vmem:[%s5632_s20 + $0x80] sm:$0xff]  ;;  %v4756_v20 = vmov 0.0  }
   0xe   :  { %v4547_v25 = vpack.c.bf16 %v81_v24, %v80_v23  ;;  %v83_v27 = vld [vmem:[%s5632_s20 + $0x88] sm:$0xff]  ;;  %v84_v29 = vld [vmem:[%s5632_s20 + $0x90] sm:$0xff]  ;;  %v85_v30 = vld [vmem:[%s5632_s20 + $0x98] sm:$0xff] }
   0xf   :  { %4530 = vmatpush1.bf16.msra.mxu0 %v4529_v6  ;;  %v4550_v28 = vpack.c.bf16 %v83_v27, %v82_v26  ;;  %v4553_v31 = vpack.c.bf16 %v85_v30, %v84_v29  ;;  %v86_v32 = vld [vmem:[%s5632_s20 + $0xa0] sm:$0xff]  ;;  %v87_v33 = vld [vmem:[%s5632_s20 + $0xa8] sm:$0xff]  ;;  %v88_v35 = vld [vmem:[%s5632_s20 + $0xb0] sm:$0xff] }
  0x10   :  { %4531 = vmatprep.subr.bf16.mxu0 %v4755_v0  ;;  %v4556_v34 = vpack.c.bf16 %v87_v33, %v86_v32  ;;  %v89_v36 = vld [vmem:[%s5632_s20 + $0xb8] sm:$0xff]  ;;  %v62_v38 = vld [vmem:[%s5633_s22] sm:$0xff]  ;;  %v64_v40 = vld [vmem:[%s5633_s22 + $0x10] sm:$0xff]  ;;  %s5618_s20 = smov 104  }
  0x11   :  { %v4559_v37 = vpack.c.bf16 %v89_v36, %v88_v35  ;;  %v65_v39 = vld [vmem:[%s5633_s22 + $0x18] sm:$0xff]  ;;  %v90_v41 = vld [vmem:[%s5634_s1] sm:$0xff]  ;;  %v91_v45 = vld [vmem:[%s5634_s1 + $0x8] sm:$0xff]  ;;  %s4758_s22 = smov 96   ;;  %s5612_s1 = smov 8  }
  0x12   :  { %v224_v61 = vld [vmem:[%s5635_s5] sm:$0xff]  ;;  %v225_v62 = vld [vmem:[%s5635_s5 + $0x8] sm:$0xff]  ;;  %v226_v63 = vld [vmem:[%s5635_s5 + $0x10] sm:$0xff] }
  0x13   :  { %4533 = vmatpush1.bf16.msra.mxu0 %v4532_v9  ;;  %v4561_v1 = vpack.c.bf16 %v225_v62, %v224_v61  ;;  %v227_v2 = vld [vmem:[%s5635_s5 + $0x18] sm:$0xff]  ;;  %v4013_v11 = vld [vmem:[%s5592_s3] ss:$0 sm:$0xff] }
  0x14   :  { %4534 = vmatprep.subr.bf16.mxu0 %v4755_v0  ;;  %v4565_v3 = vpack.c.bf16 %v227_v2, %v226_v63  ;;  %v4015_v21 = vld [vmem:[%s5594_s6] ss:$0 sm:$0xff] }
  0x15   :  { %4562 = vmatprep.subr.bf16.mxu1 %v4561_v1 }
  0x16   :  { %4564 = vmatpush3.bf16.msra.mxu1 %v4561_v1 }
  0x17   :  { %4536 = vmatpush1.bf16.msra.mxu0 %v4535_v13  ;;  %4566 = vmatprep.subr.bf16.mxu1 %v4565_v3  ;;  %v4014_v13 = vld [vmem:[%s5593_s4] ss:$0 sm:$0xff] }
  0x18   :  { %4537 = vmatprep.subr.bf16.mxu0 %v4755_v0 }
  0x1a   :  { %4568 = vmatpush3.bf16.msra.mxu1 %v4565_v3 }
  0x1b   :  { %4539 = vmatpush1.bf16.msra.mxu0 %v4538_v16  ;;  %4261 = vmatprep.subr.mxu1 %v4756_v20 }
  0x1c   :  { %4540 = vmatprep.subr.bf16.mxu0 %v4755_v0 }
  0x1f   :  { %4542 = vmatpush1.bf16.msra.mxu0 %v4541_v19 }
  0x20   :  { %4543 = vmatprep.subr.bf16.mxu0 %v4755_v0 }
  0x23   :  { %4545 = vmatpush1.bf16.msra.mxu0 %v4544_v22 }
  0x24   :  { %4546 = vmatprep.subr.bf16.mxu0 %v4755_v0 }
  0x27   :  { %4548 = vmatpush1.bf16.msra.mxu0 %v4547_v25 }
  0x28   :  { %4549 = vmatprep.subr.bf16.mxu0 %v4755_v0 }
  0x2b   :  { %4551 = vmatpush1.bf16.msra.mxu0 %v4550_v28  ;;  %v174_v28 = vlaneseq }
  0x2c   :  { %4552 = vmatprep.subr.bf16.mxu0 %v4755_v0 }
  0x2d   :  { %v175_v29 = vand.u32 127, %v174_v28 }
  0x2f   :  { %4554 = vmatpush1.bf16.msra.mxu0 %v4553_v31  ;;  %vm176_vm4 = vcmp.lt.s32.totalorder %v175_v29, 5  ;;  %v4759_v31 = vmov -1e+09  }
  0x30   :  { %4555 = vmatprep.subr.bf16.mxu0 %v4755_v0  ;;  %v5038_v32 = vsel %vm176_vm4, 0.0, %v4759_v31 }
  0x33   :  { %4557 = vmatpush1.bf16.msra.mxu0 %v4556_v34 }
  0x34   :  { %4558 = vmatprep.subr.bf16.mxu0 %v4755_v0 }
  0x37   :  { %4560 = vmatpush1.bf16.msra.mxu0 %v4559_v37 }
  0x38   :  { %4316 = vmatprep.subr.mxu0 %v4756_v20 }
  0x3a   :  { %164 = vmatmul.mubr.f32.vlgmr.msra.gmra.mrb[0].mxu0 %v62_v38 }
  0x3b   :  { %4012 = vmatprep.mubr.msk.f32.mxu0 %vm92_vm0, %v65_v39 }
  0x3e   :  { %169 = vmatmul.mubr.f32.gmra.mrb[2].mxu0 %v64_v40 }
  0x3f   :  { %4318 = vmatprep.mubr.msk.f32.mxu0 %vm4757_vm2, %v4756_v20 }
 0x10d   :  { %v165_v42 = vpop.f32.mrb[0].mxu0 }
 0x10e   :  { %v4974_v43 = vadd.f32 %v165_v42, %v90_v41  ;;  %v167_v44 = vpop.f32.mrb[1].mxu0 }
 0x110   :  { %v181_v46 = vsel %vm180_vm1, %v4974_v43, 0.0 }
 0x111   :  { %v170_v47 = vpop.f32.mrb[2].mxu0  ;;  %182 = vadd.xlane.f32.xlu0 %v181_v46 }
 0x112   :  { %v4981_v48 = vadd.f32 %v170_v47, %v91_v45  ;;  %v172_v49 = vpop.f32.mrb[3].mxu0 }
 0x114   :  { %v184_v50 = vsel %vm180_vm1, %v4981_v48, 0.0 }
 0x115   :  { %185 = vadd.xlane.f32.xlu0 %v184_v50 }
 0x19e   :  { %v183_v51 = vpop.xlane.xlu0 %182 }
 0x19f   :  { %v188_v52 = vmul.f32 0.03125, %v183_v51 }
 0x1a1   :  { %v190_v53 = vsub.f32 %v4974_v43, %v188_v52 }
 0x1a2   :  { %v186_v54 = vpop.xlane.xlu0 %185 }
 0x1a3   :  { %v189_v55 = vmul.f32 0.03125, %v186_v54  ;;  %v192_v56 = vmul.f32 %v190_v53, %v190_v53 }
 0x1a5   :  { %v191_v57 = vsub.f32 %v4981_v48, %v189_v55  ;;  %v194_v58 = vsel %vm180_vm1, %v192_v56, 0.0 }
 0x1a6   :  { %195 = vadd.xlane.f32.xlu1 %v194_v58 }
 0x1a7   :  { %v193_v59 = vmul.f32 %v191_v57, %v191_v57 }
 0x1a9   :  { %v197_v60 = vsel %vm180_vm1, %v193_v59, 0.0 }
 0x1aa   :  { %198 = vadd.xlane.f32.xlu1 %v197_v60 }
 0x233   :  { %v196_v4 = vpop.xlane.xlu1 %195 }
 0x234   :  { %v200_v5 = vmul.f32 0.03125, %v196_v4 }
 0x236   :  { %v202_v6 = vadd.f32 1e-12, %v200_v5 }
 0x237   :  { %v199_v7 = vpop.xlane.xlu1 %198 }
 0x238   :  { %4665 = vrsqrt.f32 %v202_v6  ;;  %v201_v8 = vmul.f32 0.03125, %v199_v7 }
 0x23a   :  { %v203_v9 = vadd.f32 1e-12, %v201_v8 }
 0x23c   :  { %4667 = vrsqrt.f32 %v203_v9 }
 0x242   :  { %v4666_v10 = vpop.eup %4665 }
 0x243   :  { %v206_v12 = vmul.f32 %v4666_v10, %v190_v53 }
 0x245   :  { %v214_v14 = vmul.f32 %v4013_v11, %v206_v12 }
 0x246   :  { %v4668_v15 = vpop.eup %4667 }
 0x247   :  { %v207_v16 = vmul.f32 %v4668_v15, %v191_v57  ;;  %v222_v17 = vadd.f32 %v4014_v13, %v214_v14 }
 0x249   :  { %v215_v18 = vmul.f32 %v4013_v11, %v207_v16  ;;  %4258 = vmatprep.mubr.msk.f32.mxu1 %vm180_vm1, %v222_v17 }
 0x24b   :  { %v223_v19 = vadd.f32 %v4014_v13, %v215_v18 }
 0x24d   :  { %4259 = vmatmul.mubr.msk.f32.vlgmr.msra.gmra.mrb[0].mxu1 %vm180_vm1, %v223_v19 }
 0x24e   :  { %4263 = vmatprep.mubr.msk.f32.mxu1 %vm4757_vm2, %v4756_v20 }
 0x320   :  { %v4260_v22 = vpop.f32.mrb[0].mxu1 }
 0x321   :  { %v5018_v23 = vadd.f32 %v4260_v22, %v4015_v21  ;;  %v307_v24 = vpop.f32.mrb[1].mxu1 }
 0x322   :  { %v5020_v25 = vadd.f32 %v4015_v21, %v307_v24 }
 0x323   :  { %395 = vrot.lane.b32.xlu1 %v5018_v23, %s4758_s22 }
 0x324   :  { %317 = vrot.lane.b32.xlu0 %v5020_v25, %s4758_s22 }
 0x395   :  { %v396_v27 = vpop.permute.xlu1 %395 }
 0x396   :  { %v318_v26 = vpop.permute.xlu0 %317 }
 0x397   :  { %4262 = vmatpush3.xpose.msk.msra.mxu1 %vm319_vm3, %v318_v26 }
 0x398   :  { %4266 = vmatprep.subr.mxu1 %v4756_v20 }
 0x39a   :  { %4264 = vmatmul.mubr.msk.f32.vlgmr.msra.gmra.mrb[2].mxu1 %vm319_vm3, %v5020_v25 }
 0x39b   :  { %4267 = vmatpush3.xpose.msk.msra.mxu1 %vm319_vm3, %v396_v27  ;;  %4268 = vmatprep.mubr.msk.f32.mxu1 %vm4757_vm2, %v4756_v20 }
 0x39c   :  { %4271 = vmatprep.subr.mxu1 %v4756_v20 }
 0x39e   :  { %4269 = vmatmul.mubr.msk.f32.vlgmr.msra.gmra.mrb[4].mxu1 %vm319_vm3, %v5018_v23 }
 0x39f   :  { %4273 = vmatprep.mubr.msk.f32.mxu1 %vm4757_vm2, %v4756_v20 }
 0x46d   :  { %v390_v30 = vpop.f32.mrb[2].mxu1 }
 0x46e   :  { %v471_v33 = vmul.f32 0.35355338, %v390_v30  ;;  %v4265_v34 = vpop.f32.mrb[3].mxu1 }
 0x470   :  { %v473_v35 = vadd.f32 %v471_v33, %v5038_v32 }
 0x471   :  { %v467_v36 = vpop.f32.mrb[4].mxu1 }
 0x472   :  { %v472_v37 = vmul.f32 0.35355338, %v467_v36  ;;  %v4270_v38 = vpop.f32.mrb[5].mxu1  ;;  %v475_v39 = vsel %vm319_vm3, %v473_v35, -inf }
 0x473   :  { %476 = vmax.xlane.f32.xlu1 %v475_v39 }
 0x474   :  { %v474_v40 = vadd.f32 %v472_v37, %v5038_v32 }
 0x476   :  { %v478_v41 = vsel %vm319_vm3, %v474_v40, -inf }
 0x477   :  { %479 = vmax.xlane.f32.xlu0 %v478_v41 }
 0x484   :  { %573 = vrot.lane.b32.xlu1 %v5018_v23, %s4760_s25 }
 0x488   :  { %651 = vrot.lane.b32.xlu1 %v5020_v25, %s4761_s26 }
 0x500   :  { %v477_v42 = vpop.xlane.xlu1 %476 }
 0x501   :  { %v481_v44 = vsub.f32 %v473_v35, %v477_v42 }
 0x503   :  { %v483_v45 = vmul.f32 1.442695, %v481_v44 }
 0x504   :  { %v480_v46 = vpop.xlane.xlu0 %479  ;;  %v574_v54 = vpop.permute.xlu1 %573 }
 0x505   :  { %4669 = vpow2.f32 %v483_v45  ;;  %v482_v47 = vsub.f32 %v474_v40, %v480_v46 }
 0x507   :  { %v485_v49 = vmul.f32 1.442695, %v482_v47 }
 0x508   :  { %v652_v55 = vpop.permute.xlu1 %651 }
 0x509   :  { %4671 = vpow2.f32 %v485_v49 }
 0x50f   :  { %v4670_v50 = vpop.eup %4669 }
 0x510   :  { %v487_v51 = vsel %vm319_vm3, %v4670_v50, 0.0 }
 0x511   :  { %488 = vadd.xlane.f32.xlu0 %v487_v51 }
 0x513   :  { %v4672_v52 = vpop.eup %4671 }
 0x514   :  { %v490_v53 = vsel %vm319_vm3, %v4672_v52, 0.0 }
 0x515   :  { %491 = vadd.xlane.f32.xlu1 %v490_v53 }
 0x526   :  { %649 = vrot.lane.b32.xlu1 %v5020_v25, %s4762_s27 }
 0x527   :  { %497 = vrot.lane.b32.xlu0 %v5020_v25, %s4760_s25 }
 0x52a   :  { %727 = vrot.lane.b32.xlu1 %v5018_v23, %s4762_s27 }
 0x52b   :  { %729 = vrot.lane.b32.xlu0 %v5018_v23, %s4761_s26 }
 0x59e   :  { %v489_v56 = vpop.xlane.xlu0 %488 }
 0x59f   :  { %4673 = vrcp.f32 %v489_v56 }
 0x5a2   :  { %v492_v57 = vpop.xlane.xlu1 %491  ;;  %v498_v58 = vpop.permute.xlu0 %497 }
 0x5a3   :  { %4675 = vrcp.f32 %v492_v57  ;;  %4272 = vmatpush3.msra.mxu1 %v498_v58 }
 0x5a4   :  { %4276 = vmatprep.subr.mxu1 %v4756_v20 }
 0x5a6   :  { %v650_v63 = vpop.permute.xlu1 %649  ;;  %v730_v1 = vpop.permute.xlu0 %729 }
 0x5a9   :  { %v4674_v59 = vpop.eup %4673 }
 0x5aa   :  { %v494_v60 = vmul.f32 %v4674_v59, %v4670_v50  ;;  %v728_v2 = vpop.permute.xlu1 %727 }
 0x5ac   :  { %4274 = vmatmul.mubr.msk.f32.vlgmr.msra.gmra.mrb[6].mxu1 %vm319_vm3, %v494_v60 }
 0x5ad   :  { %v4676_v61 = vpop.eup %4675  ;;  %4277 = vmatpush3.msra.mxu1 %v574_v54  ;;  %4278 = vmatprep.mubr.msk.f32.mxu1 %vm4757_vm2, %v4756_v20 }
 0x5ae   :  { %v496_v62 = vmul.f32 %v4676_v61, %v4672_v52  ;;  %4281 = vmatprep.subr.mxu1 %v4756_v20 }
 0x5b0   :  { %4279 = vmatmul.mubr.msk.f32.vlgmr.msra.gmra.mrb[8].mxu1 %vm319_vm3, %v496_v62 }
 0x5b1   :  { %4283 = vmatprep.mubr.msk.f32.mxu1 %vm4757_vm2, %v4756_v20 }
 0x5b4   :  { %4282 = vmatpush3.xpose.msk.msra.mxu1 %vm319_vm3, %v652_v55 }
 0x5b5   :  { %4286 = vmatprep.subr.mxu1 %v4756_v20 }
 0x5b7   :  { %4284 = vmatmul.mubr.msk.f32.vlgmr.msra.gmra.mrb[10].mxu1 %vm319_vm3, %v650_v63 }
 0x5b8   :  { %4287 = vmatpush3.xpose.msk.msra.mxu1 %vm319_vm3, %v730_v1  ;;  %4288 = vmatprep.mubr.msk.f32.mxu1 %vm4757_vm2, %v4756_v20 }
 0x5b9   :  { %4291 = vmatprep.subr.mxu1 %v4756_v20 }
 0x5bb   :  { %4289 = vmatmul.mubr.msk.f32.vlgmr.msra.gmra.mrb[12].mxu1 %vm319_vm3, %v728_v2 }
 0x5bc   :  { %4293 = vmatprep.mubr.msk.f32.mxu1 %vm4757_vm2, %v4756_v20 }
 0x67f   :  { %v5076_v3 = vpop.f32.mrb[6].mxu1 }
 0x680   :  { %v4275_v4 = vpop.f32.mrb[7].mxu1 }
 0x683   :  { %v5078_v5 = vpop.f32.mrb[8].mxu1 }
 0x684   :  { %v4280_v6 = vpop.f32.mrb[9].mxu1 }
 0x68a   :  { %v723_v7 = vpop.f32.mrb[10].mxu1 }
 0x68b   :  { %v805_v8 = vmul.f32 0.35355338, %v723_v7  ;;  %v4285_v9 = vpop.f32.mrb[11].mxu1 }
 0x68d   :  { %v807_v10 = vadd.f32 %v805_v8, %v5038_v32 }
 0x68e   :  { %v801_v11 = vpop.f32.mrb[12].mxu1 }
 0x68f   :  { %v806_v12 = vmul.f32 0.35355338, %v801_v11  ;;  %v4290_v13 = vpop.f32.mrb[13].mxu1  ;;  %v809_v14 = vsel %vm319_vm3, %v807_v10, -inf }
 0x690   :  { %810 = vmax.xlane.f32.xlu0 %v809_v14 }
 0x691   :  { %v808_v15 = vadd.f32 %v806_v12, %v5038_v32 }
 0x693   :  { %v812_v16 = vsel %vm319_vm3, %v808_v15, -inf }
 0x694   :  { %813 = vmax.xlane.f32.xlu1 %v812_v16 }
 0x6a5   :  { %907 = vrot.lane.b32.xlu1 %v5018_v23, %s4763_s28 }
 0x6a9   :  { %985 = vrot.lane.b32.xlu1 %v5020_v25, %s4764_s29 }
 0x6ad   :  { %983 = vrot.lane.b32.xlu1 %v5020_v25, %s5624_s2 }
 0x6b1   :  { %1061 = vrot.lane.b32.xlu1 %v5018_v23, %s5624_s2 }
 0x71d   :  { %v811_v17 = vpop.xlane.xlu0 %810 }
 0x71e   :  { %v815_v18 = vsub.f32 %v807_v10, %v811_v17 }
 0x720   :  { %v817_v19 = vmul.f32 1.442695, %v815_v18 }
 0x721   :  { %v814_v21 = vpop.xlane.xlu1 %813 }
 0x722   :  { %4677 = vpow2.f32 %v817_v19  ;;  %v816_v22 = vsub.f32 %v808_v15, %v814_v21 }
 0x724   :  { %v819_v24 = vmul.f32 1.442695, %v816_v22 }
 0x725   :  { %v908_v34 = vpop.permute.xlu1 %907 }
 0x726   :  { %4679 = vpow2.f32 %v819_v24 }
 0x729   :  { %v986_v38 = vpop.permute.xlu1 %985 }
 0x72c   :  { %v4678_v26 = vpop.eup %4677 }
 0x72d   :  { %v821_v27 = vsel %vm319_vm3, %v4678_v26, 0.0  ;;  %v984_v40 = vpop.permute.xlu1 %983 }
 0x72e   :  { %822 = vadd.xlane.f32.xlu0 %v821_v27 }
 0x730   :  { %v4680_v28 = vpop.eup %4679 }
 0x731   :  { %v824_v29 = vsel %vm319_vm3, %v4680_v28, 0.0  ;;  %v1062_v42 = vpop.permute.xlu1 %1061 }
 0x732   :  { %825 = vadd.xlane.f32.xlu0 %v824_v29 }
 0x748   :  { %831 = vrot.lane.b32.xlu0 %v5020_v25, %s4763_s28 }
 0x74c   :  { %1063 = vrot.lane.b32.xlu0 %v5018_v23, %s4764_s29 }
 0x7bb   :  { %v823_v30 = vpop.xlane.xlu0 %822 }
 0x7bc   :  { %4681 = vrcp.f32 %v823_v30 }
 0x7bf   :  { %v826_v31 = vpop.xlane.xlu0 %825 }
 0x7c0   :  { %4683 = vrcp.f32 %v826_v31 }
 0x7c3   :  { %v832_v33 = vpop.permute.xlu0 %831 }
 0x7c4   :  { %4292 = vmatpush3.msra.mxu1 %v832_v33 }
 0x7c5   :  { %4296 = vmatprep.subr.mxu1 %v4756_v20 }
 0x7c6   :  { %v4682_v35 = vpop.eup %4681 }
 0x7c7   :  { %v828_v36 = vmul.f32 %v4682_v35, %v4678_v26  ;;  %v1064_v41 = vpop.permute.xlu0 %1063 }
 0x7c9   :  { %4294 = vmatmul.mubr.msk.f32.vlgmr.msra.gmra.mrb[14].mxu1 %vm319_vm3, %v828_v36 }
 0x7ca   :  { %v4684_v37 = vpop.eup %4683  ;;  %4297 = vmatpush3.msra.mxu1 %v908_v34  ;;  %4298 = vmatprep.mubr.msk.f32.mxu1 %vm4757_vm2, %v4756_v20 }
 0x7cb   :  { %v830_v39 = vmul.f32 %v4684_v37, %v4680_v28  ;;  %4301 = vmatprep.subr.mxu1 %v4756_v20 }
 0x7cd   :  { %4299 = vmatmul.mubr.msk.f32.vlgmr.msra.gmra.mrb[16].mxu1 %vm319_vm3, %v830_v39 }
 0x7ce   :  { %4303 = vmatprep.mubr.msk.f32.mxu1 %vm4757_vm2, %v4756_v20 }
 0x7d1   :  { %4302 = vmatpush3.xpose.msk.msra.mxu1 %vm319_vm3, %v986_v38 }
 0x7d2   :  { %4306 = vmatprep.subr.mxu1 %v4756_v20 }
 0x7d4   :  { %4304 = vmatmul.mubr.msk.f32.vlgmr.msra.gmra.mrb[18].mxu1 %vm319_vm3, %v984_v40 }
 0x7d5   :  { %4307 = vmatpush3.xpose.msk.msra.mxu1 %vm319_vm3, %v1064_v41  ;;  %4308 = vmatprep.mubr.msk.f32.mxu1 %vm4757_vm2, %v4756_v20 }
 0x7d6   :  { %4311 = vmatprep.subr.mxu1 %v4756_v20 }
 0x7d8   :  { %4309 = vmatmul.mubr.msk.f32.vlgmr.msra.gmra.mrb[20].mxu1 %vm319_vm3, %v1062_v42 }
 0x7d9   :  { %4313 = vmatprep.mubr.msk.f32.mxu1 %vm4757_vm2, %v4756_v20 }
 0x89c   :  { %v5116_v44 = vpop.f32.mrb[14].mxu1 }
 0x89d   :  { %v4295_v45 = vpop.f32.mrb[15].mxu1 }
 0x8a0   :  { %v5118_v46 = vpop.f32.mrb[16].mxu1 }
 0x8a1   :  { %v4300_v47 = vpop.f32.mrb[17].mxu1 }
 0x8a7   :  { %v1057_v49 = vpop.f32.mrb[18].mxu1 }
 0x8a8   :  { %v1139_v50 = vmul.f32 0.35355338, %v1057_v49  ;;  %v4305_v51 = vpop.f32.mrb[19].mxu1 }
 0x8aa   :  { %v1141_v52 = vadd.f32 %v1139_v50, %v5038_v32 }
 0x8ab   :  { %v1135_v53 = vpop.f32.mrb[20].mxu1 }
 0x8ac   :  { %v1140_v54 = vmul.f32 0.35355338, %v1135_v53  ;;  %v4310_v55 = vpop.f32.mrb[21].mxu1  ;;  %v1143_v56 = vsel %vm319_vm3, %v1141_v52, -inf }
 0x8ad   :  { %1144 = vmax.xlane.f32.xlu0 %v1143_v56 }
 0x8ae   :  { %v1142_v57 = vadd.f32 %v1140_v54, %v5038_v32 }
 0x8b0   :  { %v1146_v58 = vsel %vm319_vm3, %v1142_v57, -inf }
 0x8b1   :  { %1147 = vmax.xlane.f32.xlu1 %v1146_v58 }
 0x8c2   :  { %1241 = vrot.lane.b32.xlu1 %v5018_v23, %s5622_s30 }
 0x8c3   :  { %1165 = vrot.lane.b32.xlu0 %v5020_v25, %s5622_s30 }
 0x8c6   :  { %1319 = vrot.lane.b32.xlu1 %v5020_v25, %s5620_s21 }
 0x8ca   :  { %1397 = vrot.lane.b32.xlu1 %v5018_v23, %s5620_s21 }
 0x8ce   :  { %1395 = vrot.lane.b32.xlu1 %v5018_v23, %s5618_s20 }
 0x93a   :  { %v1145_v59 = vpop.xlane.xlu0 %1144 }
 0x93b   :  { %v1149_v60 = vsub.f32 %v1141_v52, %v1145_v59  ;;  %v1685_v59 = vld [vmem:[%s5595_s7 + $0x10] sm:$0xff] }
 0x93d   :  { %v1151_v61 = vmul.f32 1.442695, %v1149_v60  ;;  %v1686_v60 = vld [vmem:[%s5595_s7 + $0x18] sm:$0xff] }
 0x93e   :  { %v1166_v62 = vpop.permute.xlu0 %1165  ;;  %v1148_v63 = vpop.xlane.xlu1 %1147 }
 0x93f   :  { %4685 = vpow2.f32 %v1151_v61  ;;  %v1150_v1 = vsub.f32 %v1142_v57, %v1148_v63  ;;  %4312 = vmatpush3.msra.mxu1 %v1166_v62  ;;  %v1684_v57 = vld [vmem:[%s5595_s7 + $0x8] sm:$0xff]  ;;  %v4573_v61 = vpack.c.bf16 %v1686_v60, %v1685_v59 }
 0x940   :  { %4321 = vmatprep.subr.mxu1 %v4756_v20  ;;  %v1932_v59 = vld [vmem:[%s5600_s13 + $0x8] sm:$0xff] }
 0x941   :  { %v1153_v2 = vmul.f32 1.442695, %v1150_v1 }
 0x942   :  { %v1242_v4 = vpop.permute.xlu1 %1241 }
 0x943   :  { %4687 = vpow2.f32 %v1153_v2  ;;  %4317 = vmatpush3.msra.mxu0 %v1242_v4 }
 0x944   :  { %4326 = vmatprep.subr.mxu0 %v4756_v20 }
 0x946   :  { %v1320_v12 = vpop.permute.xlu1 %1319 }
 0x949   :  { %v4686_v6 = vpop.eup %4685 }
 0x94a   :  { %v1155_v7 = vsel %vm319_vm3, %v4686_v6, 0.0  ;;  %v1398_v16 = vpop.permute.xlu1 %1397 }
 0x94b   :  { %1156 = vadd.xlane.f32.xlu0 %v1155_v7 }
 0x94d   :  { %v4688_v8 = vpop.eup %4687 }
 0x94e   :  { %v1158_v9 = vsel %vm319_vm3, %v4688_v8, 0.0  ;;  %v1396_v19 = vpop.permute.xlu1 %1395 }
 0x94f   :  { %1159 = vadd.xlane.f32.xlu0 %v1158_v9 }
 0x965   :  { %1317 = vrot.lane.b32.xlu0 %v5020_v25, %s5618_s20 }
 0x9d8   :  { %v1157_v10 = vpop.xlane.xlu0 %1156 }
 0x9d9   :  { %4689 = vrcp.f32 %v1157_v10 }
 0x9dc   :  { %v1160_v11 = vpop.xlane.xlu0 %1159 }
 0x9dd   :  { %4691 = vrcp.f32 %v1160_v11 }
 0x9e0   :  { %v1318_v18 = vpop.permute.xlu0 %1317 }
 0x9e3   :  { %v4690_v13 = vpop.eup %4689 }
 0x9e4   :  { %v1162_v14 = vmul.f32 %v4690_v13, %v4686_v6 }
 0x9e6   :  { %4314 = vmatmul.mubr.msk.f32.vlgmr.msra.gmra.mrb[22].mxu1 %vm319_vm3, %v1162_v14 }
 0x9e7   :  { %v4692_v15 = vpop.eup %4691  ;;  %4322 = vmatpush3.xpose.msk.msra.mxu1 %vm319_vm3, %v1320_v12  ;;  %4323 = vmatprep.mubr.msk.f32.mxu1 %vm4757_vm2, %v4756_v20 }
 0x9e8   :  { %v1164_v17 = vmul.f32 %v4692_v15, %v4688_v8  ;;  %4331 = vmatprep.subr.mxu1 %v4756_v20 }
 0x9ea   :  { %4319 = vmatmul.mubr.msk.f32.vlgmr.msra.gmra.mrb[4].mxu0 %vm319_vm3, %v1164_v17  ;;  %4324 = vmatmul.mubr.msk.f32.vlgmr.msra.gmra.mrb[24].mxu1 %vm319_vm3, %v1318_v18 }
 0x9eb   :  { %4327 = vmatpush3.xpose.msk.msra.mxu0 %vm319_vm3, %v1398_v16  ;;  %4328 = vmatprep.mubr.msk.f32.mxu0 %vm4757_vm2, %v4756_v20 }
 0x9ec   :  { %4336 = vmatprep.subr.mxu0 %v4756_v20  ;;  %4333 = vmatprep.mubr.msk.f32.mxu1 %vm4757_vm2, %v4756_v20 }
 0x9ee   :  { %4329 = vmatmul.mubr.msk.f32.vlgmr.msra.gmra.mrb[6].mxu0 %vm319_vm3, %v1396_v19 }
 0x9ef   :  { %4338 = vmatprep.mubr.msk.f32.mxu0 %vm4757_vm2, %v4756_v20 }
 0xab9   :  { %v1237_v21 = vpop.f32.mrb[22].mxu1 }
 0xaba   :  { %v4315_v22 = vpop.f32.mrb[23].mxu1 }
 0xabd   :  { %v1313_v24 = vpop.f32.mrb[4].mxu0  ;;  %v1391_v26 = vpop.f32.mrb[24].mxu1 }
 0xabe   :  { %v1473_v27 = vmul.f32 0.35355338, %v1391_v26  ;;  %v4320_v28 = vpop.f32.mrb[5].mxu0  ;;  %v4325_v29 = vpop.f32.mrb[25].mxu1 }
 0xac0   :  { %v1475_v30 = vadd.f32 %v1473_v27, %v5038_v32 }
 0xac1   :  { %v1469_v31 = vpop.f32.mrb[6].mxu0 }
 0xac2   :  { %v1474_v33 = vmul.f32 0.35355338, %v1469_v31  ;;  %v4330_v34 = vpop.f32.mrb[7].mxu0  ;;  %v1477_v35 = vsel %vm319_vm3, %v1475_v30, -inf }
 0xac3   :  { %1478 = vmax.xlane.f32.xlu0 %v1477_v35 }
 0xac4   :  { %v1476_v36 = vadd.f32 %v1474_v33, %v5038_v32 }
 0xac6   :  { %v1480_v37 = vsel %vm319_vm3, %v1476_v36, -inf }
 0xac7   :  { %1481 = vmax.xlane.f32.xlu1 %v1480_v37  ;;  %v1822_v37 = vld [vmem:[%s5597_s11 + $0x8] sm:$0xff] }
 0xad8   :  { %1575 = vrot.lane.b32.xlu1 %v5018_v23, %s5614_s0 }
 0xadc   :  { %1653 = vrot.lane.b32.xlu1 %v5116_v44, %s5612_s1 }
 0xae0   :  { %1655 = vrot.lane.b32.xlu1 %v5118_v46, %s5612_s1  ;;  %s5626_s1 = smov 24  }
 0xae4   :  { %1663 = vrot.lane.b32.xlu1 %v1313_v24, %s5616_s23 }
 0xb50   :  { %v1479_v38 = vpop.xlane.xlu0 %1478 }
 0xb51   :  { %v1483_v39 = vsub.f32 %v1475_v30, %v1479_v38 }
 0xb53   :  { %v1485_v40 = vmul.f32 1.442695, %v1483_v39  ;;  %v1823_v39 = vld [vmem:[%s5597_s11 + $0x10] sm:$0xff] }
 0xb54   :  { %v1482_v41 = vpop.xlane.xlu1 %1481 }
 0xb55   :  { %4693 = vpow2.f32 %v1485_v40  ;;  %v1484_v42 = vsub.f32 %v1476_v36, %v1482_v41  ;;  %v1821_v36 = vld [vmem:[%s5597_s11] sm:$0xff]  ;;  %v1824_v40 = vld [vmem:[%s5597_s11 + $0x18] sm:$0xff] }
 0xb56   :  { %v4577_v38 = vpack.c.bf16 %v1822_v37, %v1821_v36  ;;  %v4581_v41 = vpack.c.bf16 %v1824_v40, %v1823_v39 }
 0xb57   :  { %v1487_v45 = vmul.f32 1.442695, %v1484_v42 }
 0xb58   :  { %v1576_v47 = vpop.permute.xlu1 %1575 }
 0xb59   :  { %4695 = vpow2.f32 %v1487_v45  ;;  %4337 = vmatpush3.msra.mxu0 %v1576_v47 }
 0xb5a   :  { %4578 = vmatprep.subr.bf16.mxu0 %v4577_v38 }
 0xb5c   :  { %v1654_v4 = vpop.permute.xlu1 %1653 }
 0xb5d   :  { %v1675_v8 = vsel %vm319_vm3, %v5076_v3, %v1654_v4  ;;  %v4042_v3 = vld [vmem:[%s5596_s8] ss:$0 sm:$0xff] }
 0xb5f   :  { %v4694_v23 = vpop.eup %4693 }
 0xb60   :  { %v1489_v49 = vsel %vm319_vm3, %v4694_v23, 0.0  ;;  %v1656_v6 = vpop.permute.xlu1 %1655 }
 0xb61   :  { %1490 = vadd.xlane.f32.xlu0 %v1489_v49  ;;  %v1676_v13 = vsel %vm319_vm3, %v5078_v5, %v1656_v6  ;;  %v1937_v6 = vld [vmem:[%s5600_s13 + $0x30] sm:$0xff] }
 0xb63   :  { %v4696_v44 = vpop.eup %4695 }
 0xb64   :  { %v1492_v46 = vsel %vm319_vm3, %v4696_v44, 0.0  ;;  %v1664_v9 = vpop.permute.xlu1 %1663 }
 0xb65   :  { %1493 = vadd.xlane.f32.xlu0 %v1492_v46  ;;  %v1679_v14 = vsel %vm1677_vm6, %v1676_v13, %v1664_v9  ;;  %v4047_v9 = vld [vmem:[%s5601_s12] ss:$0 sm:$0xff] }
 0xb7b   :  { %1499 = vrot.lane.b32.xlu0 %v5020_v25, %s5614_s0  ;;  %v1683_v25 = vld [vmem:[%s5595_s7] sm:$0xff]  ;;  %s5643_s0 = smov 24  }
 0xb7c   :  { %v4569_v58 = vpack.c.bf16 %v1684_v57, %v1683_v25 }
 0xb7f   :  { %1661 = vrot.lane.b32.xlu0 %v1237_v21, %s5616_s23 }
 0xbee   :  { %v1491_v50 = vpop.xlane.xlu0 %1490 }
 0xbef   :  { %4697 = vrcp.f32 %v1491_v50  ;;  %v4045_v50 = vld [vmem:[%s5598_s9] ss:$0 sm:$0xff] }
 0xbf2   :  { %v1494_v51 = vpop.xlane.xlu0 %1493 }
 0xbf3   :  { %4699 = vrcp.f32 %v1494_v51 }
 0xbf6   :  { %v1500_v52 = vpop.permute.xlu0 %1499 }
 0xbf7   :  { %4332 = vmatpush3.msra.mxu1 %v1500_v52  ;;  %v4046_v52 = vld [vmem:[%s5599_s10] ss:$0 sm:$0xff] }
 0xbf8   :  { %4570 = vmatprep.subr.bf16.mxu1 %v4569_v58 }
 0xbf9   :  { %v4698_v53 = vpop.eup %4697 }
 0xbfa   :  { %v1496_v54 = vmul.f32 %v4698_v53, %v4694_v23  ;;  %v1662_v7 = vpop.permute.xlu0 %1661 }
 0xbfb   :  { %v1678_v10 = vsel %vm1677_vm6, %v1675_v8, %v1662_v7  ;;  %v1938_v7 = vld [vmem:[%s5600_s13 + $0x38] sm:$0xff] }
 0xbfc   :  { %4334 = vmatmul.mubr.msk.f32.vlgmr.msra.gmra.mrb[26].mxu1 %vm319_vm3, %v1496_v54  ;;  %v4597_v8 = vpack.c.bf16 %v1938_v7, %v1937_v6  ;;  %v4056_v6 = vld [vmem:[%s5593_s4 + $0x1] ss:$0 sm:$0xff]  ;;  %s5636_s4 = smov 112  }
 0xbfd   :  { %v4700_v55 = vpop.eup %4699  ;;  %4572 = vmatpush3.bf16.msra.mxu1 %v4569_v58  ;;  %v1931_v58 = vld [vmem:[%s5600_s13] sm:$0xff] }
 0xbfe   :  { %v1498_v56 = vmul.f32 %v4700_v55, %v4696_v44  ;;  %4574 = vmatprep.subr.bf16.mxu1 %v4573_v61  ;;  %v4585_v60 = vpack.c.bf16 %v1932_v59, %v1931_v58 }
 0xc00   :  { %4339 = vmatmul.mubr.msk.f32.vlgmr.msra.gmra.mrb[8].mxu0 %vm319_vm3, %v1498_v56 }
 0xc01   :  { %4576 = vmatpush3.bf16.msra.mxu1 %v4573_v61  ;;  %4580 = vmatpush3.bf16.msra.mxu0 %v4577_v38  ;;  %v1933_v61 = vld [vmem:[%s5600_s13 + $0x10] sm:$0xff] }
 0xc02   :  { %4582 = vmatprep.subr.bf16.mxu0 %v4581_v41  ;;  %4586 = vmatprep.subr.bf16.mxu1 %v4585_v60 }
 0xc05   :  { %4584 = vmatpush3.bf16.msra.mxu0 %v4581_v41 }
 0xccf   :  { %v1571_v62 = vpop.f32.mrb[26].mxu1 }
 0xcd0   :  { %1669 = vrot.lane.b32.xlu0 %v1571_v62, %s5626_s1  ;;  %v4335_v63 = vpop.f32.mrb[27].mxu1  ;;  %v1934_v62 = vld [vmem:[%s5600_s13 + $0x18] sm:$0xff] }
 0xcd1   :  { %v4589_v63 = vpack.c.bf16 %v1934_v62, %v1933_v61 }
 0xcd3   :  { %v1647_v1 = vpop.f32.mrb[8].mxu0 }
 0xcd4   :  { %1671 = vrot.lane.b32.xlu1 %v1647_v1, %s5626_s1  ;;  %v4340_v2 = vpop.f32.mrb[9].mxu0  ;;  %v1935_v1 = vld [vmem:[%s5600_s13 + $0x20] sm:$0xff] }
 0xcd5   :  { %v1936_v2 = vld [vmem:[%s5600_s13 + $0x28] sm:$0xff] }
 0xcd6   :  { %v4593_v4 = vpack.c.bf16 %v1936_v2, %v1935_v1  ;;  %v4055_v1 = vld [vmem:[%s5592_s3 + $0x1] ss:$0 sm:$0xff] }
 0xd42   :  { %v1670_v11 = vpop.permute.xlu0 %1669 }
 0xd43   :  { %v1681_v12 = vsel %vm1680_vm5, %v1678_v10, %v1670_v11 }
 0xd44   :  { %4349 = vmatprep.mubr.msk.f32.mxu1 %vm180_vm1, %v1681_v12 }
 0xd46   :  { %v1672_v15 = vpop.permute.xlu1 %1671 }
 0xd47   :  { %v1682_v16 = vsel %vm1680_vm5, %v1679_v14, %v1672_v15 }
 0xd48   :  { %4350 = vmatmul.mubr.msk.f32.vlgmr.msra.gmra.mrb[28].mxu1 %vm180_vm1, %v1682_v16 }
 0xd49   :  { %4588 = vmatpush3.bf16.msra.mxu1 %v4585_v60 }
 0xd4a   :  { %4590 = vmatprep.subr.bf16.mxu1 %v4589_v63 }
 0xd4d   :  { %4592 = vmatpush3.bf16.msra.mxu1 %v4589_v63 }
 0xd4e   :  { %4594 = vmatprep.subr.bf16.mxu1 %v4593_v4 }
 0xd51   :  { %4596 = vmatpush3.bf16.msra.mxu1 %v4593_v4 }
 0xd52   :  { %4598 = vmatprep.subr.bf16.mxu1 %v4597_v8 }
 0xd55   :  { %4600 = vmatpush3.bf16.msra.mxu1 %v4597_v8 }
 0xd56   :  { %4403 = vmatprep.subr.mxu1 %v4756_v20 }
 0xe1b   :  { %v4351_v17 = vpop.f32.mrb[28].mxu1 }
 0xe1c   :  { %v1772_v18 = vadd.f32 %v4351_v17, %v4042_v3  ;;  %v1766_v19 = vpop.f32.mrb[29].mxu1 }
 0xe1d   :  { %v1767_v21 = vadd.f32 %v4042_v3, %v1766_v19 }
 0xe1e   :  { %v5202_v22 = vadd.f32 %v1772_v18, %v4981_v48 }
 0xe1f   :  { %v5205_v5 = vadd.f32 %v1767_v21, %v4974_v43 }
 0xe20   :  { %v1782_v24 = vsel %vm180_vm1, %v5202_v22, 0.0 }
 0xe21   :  { %1783 = vadd.xlane.f32.xlu1 %v1782_v24  ;;  %v1779_v26 = vsel %vm180_vm1, %v5205_v5, 0.0 }
 0xe22   :  { %1780 = vadd.xlane.f32.xlu0 %v1779_v26 }
 0xeae   :  { %v1784_v27 = vpop.xlane.xlu1 %1783 }
 0xeaf   :  { %v1786_v28 = vmul.f32 0.03125, %v1784_v27  ;;  %v1781_v29 = vpop.xlane.xlu0 %1780 }
 0xeb0   :  { %v1785_v30 = vmul.f32 0.03125, %v1781_v29 }
 0xeb1   :  { %v1788_v31 = vsub.f32 %v5202_v22, %v1786_v28 }
 0xeb2   :  { %v1787_v48 = vsub.f32 %v5205_v5, %v1785_v30 }
 0xeb3   :  { %v1790_v34 = vmul.f32 %v1788_v31, %v1788_v31 }
 0xeb4   :  { %v1789_v33 = vmul.f32 %v1787_v48, %v1787_v48 }
 0xeb5   :  { %v1794_v35 = vsel %vm180_vm1, %v1790_v34, 0.0  ;;  %v4050_v34 = vld [vmem:[%s5602_s14] ss:$0 sm:$0xff] }
 0xeb6   :  { %v1791_v43 = vsel %vm180_vm1, %v1789_v33, 0.0 }
 0xeb7   :  { %1792 = vadd.xlane.f32.xlu0 %v1791_v43 }
 0xebb   :  { %1795 = vadd.xlane.f32.xlu0 %v1794_v35 }
 0xf44   :  { %v1793_v42 = vpop.xlane.xlu0 %1792 }
 0xf45   :  { %v1797_v45 = vmul.f32 0.03125, %v1793_v42 }
 0xf47   :  { %v1799_v47 = vadd.f32 1e-12, %v1797_v45 }
 0xf48   :  { %v1796_v23 = vpop.xlane.xlu0 %1795 }
 0xf49   :  { %4701 = vrsqrt.f32 %v1799_v47  ;;  %v1798_v49 = vmul.f32 0.03125, %v1796_v23 }
 0xf4b   :  { %v1800_v44 = vadd.f32 1e-12, %v1798_v49 }
 0xf4d   :  { %4703 = vrsqrt.f32 %v1800_v44 }
 0xf53   :  { %v4702_v46 = vpop.eup %4701 }
 0xf54   :  { %v1803_v51 = vmul.f32 %v4702_v46, %v1787_v48 }
 0xf56   :  { %v1811_v53 = vmul.f32 %v4045_v50, %v1803_v51 }
 0xf57   :  { %v4704_v54 = vpop.eup %4703 }
 0xf58   :  { %v1804_v55 = vmul.f32 %v4704_v54, %v1788_v31  ;;  %v1819_v56 = vadd.f32 %v4046_v52, %v1811_v53  ;;  %v4058_v53 = vld [vmem:[%s5635_s5 + $0x28] sm:$0xff] }
 0xf5a   :  { %v1812_v25 = vmul.f32 %v4045_v50, %v1804_v55  ;;  %4360 = vmatprep.mubr.msk.f32.mxu0 %vm180_vm1, %v1819_v56  ;;  %v4059_v55 = vld [vmem:[%s5635_s5 + $0x30] sm:$0xff]  ;;  %v4060_v56 = vld [vmem:[%s5635_s5 + $0x38] sm:$0xff] }
 0xf5c   :  { %v1820_v57 = vadd.f32 %v4046_v52, %v1812_v25  ;;  %v4057_v52 = vld [vmem:[%s5635_s5 + $0x20] sm:$0xff]  ;;  %v4605_v25 = vpack.c.bf16 %v4060_v56, %v4059_v55 }
 0xf5d   :  { %v4601_v54 = vpack.c.bf16 %v4058_v53, %v4057_v52 }
 0xf5e   :  { %4361 = vmatmul.mubr.msk.f32.vlgmr.msra.gmra.mrb[10].mxu0 %vm180_vm1, %v1820_v57 }
 0xf5f   :  { %4602 = vmatprep.subr.bf16.mxu0 %v4601_v54 }
 0xf60   :  { %4604 = vmatpush3.bf16.msra.mxu0 %v4601_v54 }
 0xf61   :  { %4606 = vmatprep.subr.bf16.mxu0 %v4605_v25 }
 0xf64   :  { %4608 = vmatpush3.bf16.msra.mxu0 %v4605_v25 }
 0xf65   :  { %4393 = vmatprep.subr.mxu0 %v4756_v20 }
0x1031   :  { %v4362_v10 = vpop.f32.mrb[10].mxu0 }
0x1032   :  { %v1910_v11 = vadd.f32 %v4362_v10, %v4047_v9  ;;  %v1904_v12 = vpop.f32.mrb[11].mxu0 }
0x1033   :  { %v1905_v13 = vadd.f32 %v4047_v9, %v1904_v12  ;;  %v4062_v12 = vld [vmem:[%s5594_s6 + $0x1] ss:$0 sm:$0xff]  ;;  %s5637_s6 = smov 48  }
0x1034   :  { %v1914_v14 = vmul.f32 %v1910_v11, %v1910_v11 }
0x1035   :  { %v1913_v15 = vmul.f32 %v1905_v13, %v1905_v13 }
0x1036   :  { %v1916_v16 = vmul.f32 %v1914_v14, %v1910_v11 }
0x1037   :  { %v1915_v3 = vmul.f32 %v1913_v15, %v1905_v13 }
0x1038   :  { %v1918_v17 = vmul.f32 0.044715, %v1916_v16 }
0x1039   :  { %v1917_v18 = vmul.f32 0.044715, %v1915_v3 }
0x103a   :  { %v1920_v19 = vadd.f32 %v1918_v17, %v1910_v11 }
0x103b   :  { %v1919_v21 = vadd.f32 %v1917_v18, %v1905_v13 }
0x103c   :  { %v1922_v24 = vmul.f32 0.7978846, %v1920_v19 }
0x103d   :  { %v1921_v26 = vmul.f32 0.7978846, %v1919_v21 }
0x103e   :  { %4705 = vtanh.f32 %v1922_v24 }
0x103f   :  { %4707 = vtanh.f32 %v1921_v26 }
0x1048   :  { %v4706_v27 = vpop.eup %4705 }
0x1049   :  { %v4708_v28 = vpop.eup %4707  ;;  %v1926_v29 = vadd.f32 1.0, %v4706_v27 }
0x104a   :  { %v1925_v30 = vadd.f32 1.0, %v4708_v28 }
0x104b   :  { %v1928_v31 = vmul.f32 0.5, %v1926_v29 }
0x104c   :  { %v1927_v48 = vmul.f32 0.5, %v1925_v30 }
0x104d   :  { %v1930_v43 = vmul.f32 %v1928_v31, %v1910_v11 }
0x104e   :  { %v1929_v33 = vmul.f32 %v1927_v48, %v1905_v13 }
0x1050   :  { %4379 = vmatprep.mubr.msk.f32.mxu1 %vm92_vm0, %v1929_v33 }
0x1051   :  { %4380 = vmatmul.mubr.msk.f32.vlgmr.msra.gmra.mrb[30].mxu1 %vm92_vm0, %v1930_v43 }
0x1052   :  { %4405 = vmatprep.mubr.msk.f32.mxu1 %vm4757_vm2, %v4756_v20 }
0x1124   :  { %v4381_v35 = vpop.f32.mrb[30].mxu1 }
0x1125   :  { %v2024_v36 = vadd.f32 %v4381_v35, %v4050_v34  ;;  %v2018_v37 = vpop.f32.mrb[31].mxu1 }
0x1126   :  { %v2019_v38 = vadd.f32 %v4050_v34, %v2018_v37 }
0x1127   :  { %v5271_v39 = vadd.f32 %v2024_v36, %v5202_v22 }
0x1128   :  { %v5274_v40 = vadd.f32 %v2019_v38, %v5205_v5 }
0x1129   :  { %v2036_v41 = vsel %vm180_vm1, %v5271_v39, 0.0 }
0x112a   :  { %2037 = vadd.xlane.f32.xlu1 %v2036_v41  ;;  %v2033_v42 = vsel %vm180_vm1, %v5274_v40, 0.0 }
0x112b   :  { %2034 = vadd.xlane.f32.xlu0 %v2033_v42 }
0x11b7   :  { %v2038_v45 = vpop.xlane.xlu1 %2037 }
0x11b8   :  { %v2040_v47 = vmul.f32 0.03125, %v2038_v45  ;;  %v2035_v23 = vpop.xlane.xlu0 %2034 }
0x11b9   :  { %v2039_v49 = vmul.f32 0.03125, %v2035_v23 }
0x11ba   :  { %v2042_v44 = vsub.f32 %v5271_v39, %v2040_v47 }
0x11bb   :  { %v2041_v22 = vsub.f32 %v5274_v40, %v2039_v49 }
0x11bc   :  { %v2044_v46 = vmul.f32 %v2042_v44, %v2042_v44 }
0x11bd   :  { %v2043_v50 = vmul.f32 %v2041_v22, %v2041_v22 }
0x11be   :  { %v2048_v5 = vsel %vm180_vm1, %v2044_v46, 0.0 }
0x11bf   :  { %2049 = vadd.xlane.f32.xlu1 %v2048_v5  ;;  %v2045_v51 = vsel %vm180_vm1, %v2043_v50, 0.0 }
0x11c0   :  { %2046 = vadd.xlane.f32.xlu0 %v2045_v51 }
0x124c   :  { %v2050_v57 = vpop.xlane.xlu1 %2049 }
0x124d   :  { %v2052_v58 = vmul.f32 0.03125, %v2050_v57  ;;  %v2047_v59 = vpop.xlane.xlu0 %2046 }
0x124e   :  { %v2051_v60 = vmul.f32 0.03125, %v2047_v59 }
0x124f   :  { %v2054_v61 = vadd.f32 1e-12, %v2052_v58 }
0x1250   :  { %v2053_v62 = vadd.f32 1e-12, %v2051_v60 }
0x1251   :  { %4709 = vrsqrt.f32 %v2054_v61 }
0x1252   :  { %4711 = vrsqrt.f32 %v2053_v62 }
0x125b   :  { %v4710_v63 = vpop.eup %4709 }
0x125c   :  { %v4712_v2 = vpop.eup %4711  ;;  %v2058_v4 = vmul.f32 %v4710_v63, %v2042_v44 }
0x125d   :  { %v2057_v7 = vmul.f32 %v4712_v2, %v2041_v22 }
0x125e   :  { %v2066_v8 = vmul.f32 %v4055_v1, %v2058_v4 }
0x125f   :  { %v2065_v9 = vmul.f32 %v4055_v1, %v2057_v7 }
0x1260   :  { %v2074_v10 = vadd.f32 %v4056_v6, %v2066_v8 }
0x1261   :  { %v2073_v11 = vadd.f32 %v4056_v6, %v2065_v9 }
0x1263   :  { %4390 = vmatprep.mubr.msk.f32.mxu0 %vm180_vm1, %v2073_v11 }
0x1264   :  { %4391 = vmatmul.mubr.msk.f32.vlgmr.msra.gmra.mrb[12].mxu0 %vm180_vm1, %v2074_v10 }
0x1265   :  { %4395 = vmatprep.mubr.msk.f32.mxu0 %vm4757_vm2, %v4756_v20 }
0x1337   :  { %v4392_v13 = vpop.f32.mrb[12].mxu0 }
0x1338   :  { %v5310_v14 = vadd.f32 %v4392_v13, %v4062_v12  ;;  %v2160_v15 = vpop.f32.mrb[13].mxu0 }
0x1339   :  { %v5312_v16 = vadd.f32 %v4062_v12, %v2160_v15 }
0x133a   :  { %2247 = vrot.lane.b32.xlu1 %v5310_v14, %s4758_s22 }
0x133b   :  { %2170 = vrot.lane.b32.xlu0 %v5312_v16, %s4758_s22  ;;  %s5638_s22 = smov 72  }
0x13ac   :  { %v2248_v17 = vpop.permute.xlu1 %2247 }
0x13ad   :  { %v2171_v3 = vpop.permute.xlu0 %2170 }
0x13ae   :  { %4394 = vmatpush3.xpose.msk.msra.mxu0 %vm319_vm3, %v2171_v3 }
0x13af   :  { %4398 = vmatprep.subr.mxu0 %v4756_v20 }
0x13b1   :  { %4396 = vmatmul.mubr.msk.f32.vlgmr.msra.gmra.mrb[14].mxu0 %vm319_vm3, %v5312_v16 }
0x13b2   :  { %4399 = vmatpush3.xpose.msk.msra.mxu0 %vm319_vm3, %v2248_v17  ;;  %4400 = vmatprep.mubr.msk.f32.mxu0 %vm4757_vm2, %v4756_v20 }
0x13b3   :  { %4408 = vmatprep.subr.mxu0 %v4756_v20 }
0x13b5   :  { %4401 = vmatmul.mubr.msk.f32.vlgmr.msra.gmra.mrb[16].mxu0 %vm319_vm3, %v5310_v14 }
0x13b6   :  { %4410 = vmatprep.mubr.msk.f32.mxu0 %vm4757_vm2, %v4756_v20 }
0x1484   :  { %v2242_v18 = vpop.f32.mrb[14].mxu0 }
0x1485   :  { %v2323_v19 = vmul.f32 0.35355338, %v2242_v18  ;;  %v4397_v21 = vpop.f32.mrb[15].mxu0 }
0x1487   :  { %v2325_v24 = vadd.f32 %v2323_v19, %v5038_v32 }
0x1488   :  { %v2319_v26 = vpop.f32.mrb[16].mxu0 }
0x1489   :  { %v2324_v27 = vmul.f32 0.35355338, %v2319_v26  ;;  %v4402_v28 = vpop.f32.mrb[17].mxu0  ;;  %v2327_v29 = vsel %vm319_vm3, %v2325_v24, -inf }
0x148a   :  { %2328 = vmax.xlane.f32.xlu1 %v2327_v29 }
0x148b   :  { %v2326_v30 = vadd.f32 %v2324_v27, %v5038_v32 }
0x148d   :  { %v2330_v31 = vsel %vm319_vm3, %v2326_v30, -inf }
0x148e   :  { %2331 = vmax.xlane.f32.xlu0 %v2330_v31 }
0x149b   :  { %2425 = vrot.lane.b32.xlu1 %v5310_v14, %s4760_s25 }
0x149f   :  { %2503 = vrot.lane.b32.xlu1 %v5312_v16, %s4761_s26 }
0x14a3   :  { %2581 = vrot.lane.b32.xlu1 %v5310_v14, %s4761_s26  ;;  %s5640_s26 = smov 40  }
0x14a4   :  { %2349 = vrot.lane.b32.xlu0 %v5312_v16, %s4760_s25  ;;  %s5639_s25 = smov 104  }
0x1517   :  { %v2329_v48 = vpop.xlane.xlu1 %2328 }
0x1518   :  { %v2333_v33 = vsub.f32 %v2325_v24, %v2329_v48 }
0x151a   :  { %v2335_v43 = vmul.f32 1.442695, %v2333_v33 }
0x151b   :  { %v2426_v34 = vpop.permute.xlu1 %2425  ;;  %v2332_v35 = vpop.xlane.xlu0 %2331 }
0x151c   :  { %4713 = vpow2.f32 %v2335_v43  ;;  %v2334_v36 = vsub.f32 %v2326_v30, %v2332_v35  ;;  %4409 = vmatpush3.msra.mxu0 %v2426_v34 }
0x151d   :  { %4418 = vmatprep.subr.mxu0 %v4756_v20 }
0x151e   :  { %v2337_v37 = vmul.f32 1.442695, %v2334_v36 }
0x151f   :  { %v2350_v38 = vpop.permute.xlu0 %2349  ;;  %v2504_v23 = vpop.permute.xlu1 %2503 }
0x1520   :  { %4715 = vpow2.f32 %v2337_v37  ;;  %4404 = vmatpush3.msra.mxu1 %v2350_v38 }
0x1521   :  { %4413 = vmatprep.subr.mxu1 %v4756_v20 }
0x1523   :  { %v2582_v49 = vpop.permute.xlu1 %2581 }
0x1526   :  { %v4714_v41 = vpop.eup %4713 }
0x1527   :  { %v2339_v42 = vsel %vm319_vm3, %v4714_v41, 0.0 }
0x1528   :  { %2340 = vadd.xlane.f32.xlu0 %v2339_v42 }
0x152a   :  { %v4716_v45 = vpop.eup %4715 }
0x152b   :  { %v2342_v47 = vsel %vm319_vm3, %v4716_v45, 0.0 }
0x152c   :  { %2343 = vadd.xlane.f32.xlu1 %v2342_v47 }
0x153d   :  { %2579 = vrot.lane.b32.xlu1 %v5310_v14, %s4762_s27 }
0x153e   :  { %2501 = vrot.lane.b32.xlu0 %v5312_v16, %s4762_s27  ;;  %s5641_s27 = smov 8  }
0x15b5   :  { %v2341_v44 = vpop.xlane.xlu0 %2340 }
0x15b6   :  { %4717 = vrcp.f32 %v2341_v44 }
0x15b9   :  { %v2344_v22 = vpop.xlane.xlu1 %2343  ;;  %v2502_v52 = vpop.permute.xlu0 %2501 }
0x15ba   :  { %4719 = vrcp.f32 %v2344_v22 }
0x15bd   :  { %v2580_v53 = vpop.permute.xlu1 %2579 }
0x15c0   :  { %v4718_v46 = vpop.eup %4717 }
0x15c1   :  { %v2346_v50 = vmul.f32 %v4718_v46, %v4714_v41 }
0x15c3   :  { %4406 = vmatmul.mubr.msk.f32.vlgmr.msra.gmra.mrb[32].mxu1 %vm319_vm3, %v2346_v50 }
0x15c4   :  { %v4720_v5 = vpop.eup %4719  ;;  %4414 = vmatpush3.xpose.msk.msra.mxu1 %vm319_vm3, %v2504_v23  ;;  %4415 = vmatprep.mubr.msk.f32.mxu1 %vm4757_vm2, %v4756_v20 }
0x15c5   :  { %v2348_v51 = vmul.f32 %v4720_v5, %v4716_v45  ;;  %4423 = vmatprep.subr.mxu1 %v4756_v20 }
0x15c7   :  { %4411 = vmatmul.mubr.msk.f32.vlgmr.msra.gmra.mrb[18].mxu0 %vm319_vm3, %v2348_v51  ;;  %4416 = vmatmul.mubr.msk.f32.vlgmr.msra.gmra.mrb[34].mxu1 %vm319_vm3, %v2502_v52 }
0x15c8   :  { %4419 = vmatpush3.xpose.msk.msra.mxu0 %vm319_vm3, %v2582_v49  ;;  %4420 = vmatprep.mubr.msk.f32.mxu0 %vm4757_vm2, %v4756_v20 }
0x15c9   :  { %4428 = vmatprep.subr.mxu0 %v4756_v20  ;;  %4425 = vmatprep.mubr.msk.f32.mxu1 %vm4757_vm2, %v4756_v20 }
0x15cb   :  { %4421 = vmatmul.mubr.msk.f32.vlgmr.msra.gmra.mrb[20].mxu0 %vm319_vm3, %v2580_v53 }
0x15cc   :  { %4430 = vmatprep.mubr.msk.f32.mxu0 %vm4757_vm2, %v4756_v20 }
0x1696   :  { %v5366_v54 = vpop.f32.mrb[32].mxu1 }
0x1697   :  { %v4407_v55 = vpop.f32.mrb[33].mxu1 }
0x169a   :  { %v5368_v56 = vpop.f32.mrb[18].mxu0  ;;  %v2575_v25 = vpop.f32.mrb[34].mxu1 }
0x169b   :  { %v2657_v57 = vmul.f32 0.35355338, %v2575_v25  ;;  %v4412_v58 = vpop.f32.mrb[19].mxu0  ;;  %v4417_v59 = vpop.f32.mrb[35].mxu1 }
0x169d   :  { %v2659_v60 = vadd.f32 %v2657_v57, %v5038_v32 }
0x169e   :  { %v2653_v61 = vpop.f32.mrb[20].mxu0 }
0x169f   :  { %v2658_v62 = vmul.f32 0.35355338, %v2653_v61  ;;  %v4422_v63 = vpop.f32.mrb[21].mxu0  ;;  %v2661_v1 = vsel %vm319_vm3, %v2659_v60, -inf }
0x16a0   :  { %2662 = vmax.xlane.f32.xlu0 %v2661_v1 }
0x16a1   :  { %v2660_v2 = vadd.f32 %v2658_v62, %v5038_v32 }
0x16a3   :  { %v2664_v4 = vsel %vm319_vm3, %v2660_v2, -inf }
0x16a4   :  { %2665 = vmax.xlane.f32.xlu1 %v2664_v4 }
0x16b5   :  { %2759 = vrot.lane.b32.xlu1 %v5310_v14, %s4763_s28 }
0x16b6   :  { %2683 = vrot.lane.b32.xlu0 %v5312_v16, %s4763_s28  ;;  %s5642_s28 = smov 16  }
0x16b9   :  { %2837 = vrot.lane.b32.xlu1 %v5312_v16, %s4764_s29 }
0x16bd   :  { %2915 = vrot.lane.b32.xlu1 %v5310_v14, %s4764_s29 }
0x16c1   :  { %2913 = vrot.lane.b32.xlu1 %v5310_v14, %s5636_s4 }
0x172d   :  { %v2663_v6 = vpop.xlane.xlu0 %2662 }
0x172e   :  { %v2667_v7 = vsub.f32 %v2659_v60, %v2663_v6 }
0x1730   :  { %v2669_v8 = vmul.f32 1.442695, %v2667_v7 }
0x1731   :  { %v2684_v9 = vpop.permute.xlu0 %2683  ;;  %v2666_v10 = vpop.xlane.xlu1 %2665 }
0x1732   :  { %4721 = vpow2.f32 %v2669_v8  ;;  %v2668_v11 = vsub.f32 %v2660_v2, %v2666_v10  ;;  %4424 = vmatpush3.msra.mxu1 %v2684_v9 }
0x1733   :  { %4433 = vmatprep.subr.mxu1 %v4756_v20 }
0x1734   :  { %v2671_v12 = vmul.f32 1.442695, %v2668_v11 }
0x1735   :  { %v2760_v13 = vpop.permute.xlu1 %2759 }
0x1736   :  { %4723 = vpow2.f32 %v2671_v12  ;;  %4429 = vmatpush3.msra.mxu0 %v2760_v13 }
0x1737   :  { %4438 = vmatprep.subr.mxu0 %v4756_v20 }
0x1739   :  { %v2838_v24 = vpop.permute.xlu1 %2837 }
0x173c   :  { %v4722_v15 = vpop.eup %4721 }
0x173d   :  { %v2673_v3 = vsel %vm319_vm3, %v4722_v15, 0.0  ;;  %v2916_v29 = vpop.permute.xlu1 %2915 }
0x173e   :  { %2674 = vadd.xlane.f32.xlu0 %v2673_v3 }
0x1740   :  { %v4724_v17 = vpop.eup %4723 }
0x1741   :  { %v2676_v18 = vsel %vm319_vm3, %v4724_v17, 0.0  ;;  %v2914_v48 = vpop.permute.xlu1 %2913 }
0x1742   :  { %2677 = vadd.xlane.f32.xlu0 %v2676_v18 }
0x1758   :  { %2835 = vrot.lane.b32.xlu0 %v5312_v16, %s5636_s4 }
0x17cb   :  { %v2675_v19 = vpop.xlane.xlu0 %2674 }
0x17cc   :  { %4725 = vrcp.f32 %v2675_v19 }
0x17cf   :  { %v2678_v21 = vpop.xlane.xlu0 %2677 }
0x17d0   :  { %4727 = vrcp.f32 %v2678_v21 }
0x17d3   :  { %v2836_v31 = vpop.permute.xlu0 %2835 }
0x17d6   :  { %v4726_v26 = vpop.eup %4725 }
0x17d7   :  { %v2680_v27 = vmul.f32 %v4726_v26, %v4722_v15 }
0x17d9   :  { %4426 = vmatmul.mubr.msk.f32.vlgmr.msra.gmra.mrb[36].mxu1 %vm319_vm3, %v2680_v27 }
0x17da   :  { %v4728_v28 = vpop.eup %4727  ;;  %4434 = vmatpush3.xpose.msk.msra.mxu1 %vm319_vm3, %v2838_v24  ;;  %4435 = vmatprep.mubr.msk.f32.mxu1 %vm4757_vm2, %v4756_v20 }
0x17db   :  { %v2682_v30 = vmul.f32 %v4728_v28, %v4724_v17  ;;  %4443 = vmatprep.subr.mxu1 %v4756_v20 }
0x17dd   :  { %4431 = vmatmul.mubr.msk.f32.vlgmr.msra.gmra.mrb[22].mxu0 %vm319_vm3, %v2682_v30  ;;  %4436 = vmatmul.mubr.msk.f32.vlgmr.msra.gmra.mrb[38].mxu1 %vm319_vm3, %v2836_v31 }
0x17de   :  { %4439 = vmatpush3.xpose.msk.msra.mxu0 %vm319_vm3, %v2916_v29  ;;  %4440 = vmatprep.mubr.msk.f32.mxu0 %vm4757_vm2, %v4756_v20 }
0x17df   :  { %4448 = vmatprep.subr.mxu0 %v4756_v20  ;;  %4445 = vmatprep.mubr.msk.f32.mxu1 %vm4757_vm2, %v4756_v20 }
0x17e1   :  { %4441 = vmatmul.mubr.msk.f32.vlgmr.msra.gmra.mrb[24].mxu0 %vm319_vm3, %v2914_v48 }
0x17e2   :  { %4450 = vmatprep.mubr.msk.f32.mxu0 %vm4757_vm2, %v4756_v20 }
0x18ac   :  { %v5406_v33 = vpop.f32.mrb[36].mxu1 }
0x18ad   :  { %v4427_v43 = vpop.f32.mrb[37].mxu1 }
0x18b0   :  { %v5408_v34 = vpop.f32.mrb[22].mxu0  ;;  %v2909_v35 = vpop.f32.mrb[38].mxu1 }
0x18b1   :  { %v2991_v36 = vmul.f32 0.35355338, %v2909_v35  ;;  %v4432_v37 = vpop.f32.mrb[23].mxu0  ;;  %v4437_v38 = vpop.f32.mrb[39].mxu1 }
0x18b3   :  { %v2993_v41 = vadd.f32 %v2991_v36, %v5038_v32 }
0x18b4   :  { %v2987_v42 = vpop.f32.mrb[24].mxu0 }
0x18b5   :  { %v2992_v45 = vmul.f32 0.35355338, %v2987_v42  ;;  %v4442_v47 = vpop.f32.mrb[25].mxu0  ;;  %v2995_v23 = vsel %vm319_vm3, %v2993_v41, -inf }
0x18b6   :  { %2996 = vmax.xlane.f32.xlu0 %v2995_v23  ;;  %v4090_v23 = vld [vmem:[%s5595_s7 + $0x28] sm:$0xff] }
0x18b7   :  { %v2994_v49 = vadd.f32 %v2992_v45, %v5038_v32 }
0x18b9   :  { %v2998_v44 = vsel %vm319_vm3, %v2994_v49, -inf }
0x18ba   :  { %2999 = vmax.xlane.f32.xlu1 %v2998_v44  ;;  %v4091_v44 = vld [vmem:[%s5595_s7 + $0x30] sm:$0xff] }
0x18cb   :  { %3093 = vrot.lane.b32.xlu1 %v5310_v14, %s5637_s6 }
0x18cc   :  { %3017 = vrot.lane.b32.xlu0 %v5312_v16, %s5637_s6 }
0x18cf   :  { %3171 = vrot.lane.b32.xlu1 %v5312_v16, %s5638_s22 }
0x18d3   :  { %3249 = vrot.lane.b32.xlu1 %v5310_v14, %s5638_s22 }
0x18d7   :  { %3247 = vrot.lane.b32.xlu1 %v5310_v14, %s5639_s25 }
0x1943   :  { %v2997_v22 = vpop.xlane.xlu0 %2996 }
0x1944   :  { %v3001_v46 = vsub.f32 %v2993_v41, %v2997_v22  ;;  %v4092_v22 = vld [vmem:[%s5595_s7 + $0x38] sm:$0xff] }
0x1946   :  { %v3003_v50 = vmul.f32 1.442695, %v3001_v46  ;;  %v4613_v46 = vpack.c.bf16 %v4092_v22, %v4091_v44  ;;  %v4111_v22 = vld [vmem:[%s5600_s13 + $0x50] sm:$0xff] }
0x1947   :  { %v3018_v5 = vpop.permute.xlu0 %3017  ;;  %v3000_v51 = vpop.xlane.xlu1 %2999 }
0x1948   :  { %4729 = vpow2.f32 %v3003_v50  ;;  %v3002_v52 = vsub.f32 %v2994_v49, %v3000_v51  ;;  %4444 = vmatpush3.msra.mxu1 %v3018_v5 }
0x1949   :  { %4453 = vmatprep.subr.mxu1 %v4756_v20 }
0x194a   :  { %v3005_v53 = vmul.f32 1.442695, %v3002_v52 }
0x194b   :  { %v3094_v55 = vpop.permute.xlu1 %3093 }
0x194c   :  { %4731 = vpow2.f32 %v3005_v53  ;;  %4449 = vmatpush3.msra.mxu0 %v3094_v55 }
0x194d   :  { %4458 = vmatprep.subr.mxu0 %v4756_v20 }
0x194f   :  { %v3172_v62 = vpop.permute.xlu1 %3171 }
0x1952   :  { %v4730_v25 = vpop.eup %4729 }
0x1953   :  { %v3007_v57 = vsel %vm319_vm3, %v4730_v25, 0.0  ;;  %v3250_v4 = vpop.permute.xlu1 %3249 }
0x1954   :  { %3008 = vadd.xlane.f32.xlu0 %v3007_v57 }
0x1956   :  { %v4732_v58 = vpop.eup %4731 }
0x1957   :  { %v3010_v59 = vsel %vm319_vm3, %v4732_v58, 0.0  ;;  %v3248_v8 = vpop.permute.xlu1 %3247 }
0x1958   :  { %3011 = vadd.xlane.f32.xlu0 %v3010_v59 }
0x196e   :  { %3169 = vrot.lane.b32.xlu0 %v5312_v16, %s5639_s25 }
0x19e1   :  { %v3009_v60 = vpop.xlane.xlu0 %3008 }
0x19e2   :  { %4733 = vrcp.f32 %v3009_v60 }
0x19e5   :  { %v3012_v61 = vpop.xlane.xlu0 %3011 }
0x19e6   :  { %4735 = vrcp.f32 %v3012_v61 }
0x19e9   :  { %v3170_v7 = vpop.permute.xlu0 %3169 }
0x19ec   :  { %v4734_v63 = vpop.eup %4733 }
0x19ed   :  { %v3014_v1 = vmul.f32 %v4734_v63, %v4730_v25 }
0x19ef   :  { %4446 = vmatmul.mubr.msk.f32.vlgmr.msra.gmra.mrb[40].mxu1 %vm319_vm3, %v3014_v1 }
0x19f0   :  { %v4736_v2 = vpop.eup %4735  ;;  %4454 = vmatpush3.xpose.msk.msra.mxu1 %vm319_vm3, %v3172_v62  ;;  %4455 = vmatprep.mubr.msk.f32.mxu1 %vm4757_vm2, %v4756_v20 }
0x19f1   :  { %v3016_v6 = vmul.f32 %v4736_v2, %v4732_v58  ;;  %4463 = vmatprep.subr.mxu1 %v4756_v20 }
0x19f3   :  { %4451 = vmatmul.mubr.msk.f32.vlgmr.msra.gmra.mrb[26].mxu0 %vm319_vm3, %v3016_v6  ;;  %4456 = vmatmul.mubr.msk.f32.vlgmr.msra.gmra.mrb[42].mxu1 %vm319_vm3, %v3170_v7 }
0x19f4   :  { %4459 = vmatpush3.xpose.msk.msra.mxu0 %vm319_vm3, %v3250_v4  ;;  %4460 = vmatprep.mubr.msk.f32.mxu0 %vm4757_vm2, %v4756_v20 }
0x19f5   :  { %4468 = vmatprep.subr.mxu0 %v4756_v20  ;;  %4465 = vmatprep.mubr.msk.f32.mxu1 %vm4757_vm2, %v4756_v20 }
0x19f7   :  { %4461 = vmatmul.mubr.msk.f32.vlgmr.msra.gmra.mrb[28].mxu0 %vm319_vm3, %v3248_v8 }
0x19f8   :  { %4470 = vmatprep.mubr.msk.f32.mxu0 %vm4757_vm2, %v4756_v20 }
0x1ac2   :  { %v3089_v9 = vpop.f32.mrb[40].mxu1 }
0x1ac3   :  { %v4447_v10 = vpop.f32.mrb[41].mxu1 }
0x1ac6   :  { %v3165_v11 = vpop.f32.mrb[26].mxu0  ;;  %v3243_v12 = vpop.f32.mrb[42].mxu1 }
0x1ac7   :  { %v3325_v13 = vmul.f32 0.35355338, %v3243_v12  ;;  %v4452_v15 = vpop.f32.mrb[27].mxu0  ;;  %v4457_v3 = vpop.f32.mrb[43].mxu1 }
0x1ac9   :  { %v3327_v17 = vadd.f32 %v3325_v13, %v5038_v32 }
0x1aca   :  { %v3321_v18 = vpop.f32.mrb[28].mxu0 }
0x1acb   :  { %v3326_v19 = vmul.f32 0.35355338, %v3321_v18  ;;  %v4462_v21 = vpop.f32.mrb[29].mxu0  ;;  %v3329_v24 = vsel %vm319_vm3, %v3327_v17, -inf }
0x1acc   :  { %3330 = vmax.xlane.f32.xlu0 %v3329_v24  ;;  %v4101_v24 = vld [vmem:[%s5597_s11 + $0x20] sm:$0xff] }
0x1acd   :  { %v3328_v26 = vadd.f32 %v3326_v19, %v5038_v32 }
0x1acf   :  { %v3332_v27 = vsel %vm319_vm3, %v3328_v26, -inf }
0x1ad0   :  { %3333 = vmax.xlane.f32.xlu1 %v3332_v27 }
0x1ae1   :  { %3427 = vrot.lane.b32.xlu1 %v5310_v14, %s5640_s26 }
0x1ae5   :  { %3505 = vrot.lane.b32.xlu1 %v5406_v33, %s5641_s27 }
0x1ae9   :  { %3507 = vrot.lane.b32.xlu1 %v5408_v34, %s5641_s27 }
0x1aed   :  { %3515 = vrot.lane.b32.xlu1 %v3165_v11, %s5642_s28 }
0x1b59   :  { %v3331_v28 = vpop.xlane.xlu0 %3330 }
0x1b5a   :  { %v3335_v29 = vsub.f32 %v3327_v17, %v3331_v28  ;;  %v4103_v28 = vld [vmem:[%s5597_s11 + $0x30] sm:$0xff] }
0x1b5c   :  { %v3337_v30 = vmul.f32 1.442695, %v3335_v29  ;;  %v4104_v29 = vld [vmem:[%s5597_s11 + $0x38] sm:$0xff] }
0x1b5d   :  { %v3334_v31 = vpop.xlane.xlu1 %3333 }
0x1b5e   :  { %4737 = vpow2.f32 %v3337_v30  ;;  %v3336_v32 = vsub.f32 %v3328_v26, %v3334_v31  ;;  %v4102_v26 = vld [vmem:[%s5597_s11 + $0x28] sm:$0xff]  ;;  %v4621_v30 = vpack.c.bf16 %v4104_v29, %v4103_v28 }
0x1b5f   :  { %v4617_v27 = vpack.c.bf16 %v4102_v26, %v4101_v24 }
0x1b60   :  { %v3339_v48 = vmul.f32 1.442695, %v3336_v32 }
0x1b61   :  { %v3428_v43 = vpop.permute.xlu1 %3427 }
0x1b62   :  { %4739 = vpow2.f32 %v3339_v48  ;;  %4469 = vmatpush3.msra.mxu0 %v3428_v43 }
0x1b63   :  { %4618 = vmatprep.subr.bf16.mxu0 %v4617_v27 }
0x1b65   :  { %v3506_v53 = vpop.permute.xlu1 %3505 }
0x1b66   :  { %v3527_v57 = vsel %vm319_vm3, %v5366_v54, %v3506_v53  ;;  %v4094_v54 = vld [vmem:[%s5596_s8 + $0x1] ss:$0 sm:$0xff]  ;;  %v4116_v53 = vld [vmem:[%s5600_s13 + $0x78] sm:$0xff] }
0x1b68   :  { %v4738_v35 = vpop.eup %4737 }
0x1b69   :  { %v3341_v14 = vsel %vm319_vm3, %v4738_v35, 0.0  ;;  %v3508_v55 = vpop.permute.xlu1 %3507 }
0x1b6a   :  { %3342 = vadd.xlane.f32.xlu0 %v3341_v14  ;;  %v3528_v62 = vsel %vm319_vm3, %v5368_v56, %v3508_v55 }
0x1b6c   :  { %v4740_v33 = vpop.eup %4739 }
0x1b6d   :  { %v3344_v36 = vsel %vm319_vm3, %v4740_v33, 0.0  ;;  %v3516_v58 = vpop.permute.xlu1 %3515 }
0x1b6e   :  { %3345 = vadd.xlane.f32.xlu0 %v3344_v36  ;;  %v3530_v63 = vsel %vm1677_vm6, %v3528_v62, %v3516_v58  ;;  %v4099_v36 = vld [vmem:[%s5598_s9 + $0x1] ss:$0 sm:$0xff] }
0x1b84   :  { %3351 = vrot.lane.b32.xlu0 %v5312_v16, %s5640_s26  ;;  %v4089_v16 = vld [vmem:[%s5595_s7 + $0x20] sm:$0xff] }
0x1b85   :  { %v4609_v49 = vpack.c.bf16 %v4090_v23, %v4089_v16  ;;  %v4109_v23 = vld [vmem:[%s5600_s13 + $0x40] sm:$0xff] }
0x1b88   :  { %3513 = vrot.lane.b32.xlu0 %v3089_v9, %s5642_s28 }
0x1bf7   :  { %v3343_v34 = vpop.xlane.xlu0 %3342 }
0x1bf8   :  { %4741 = vrcp.f32 %v3343_v34 }
0x1bfb   :  { %v3346_v37 = vpop.xlane.xlu0 %3345 }
0x1bfc   :  { %4743 = vrcp.f32 %v3346_v37  ;;  %v4100_v37 = vld [vmem:[%s5599_s10 + $0x1] ss:$0 sm:$0xff] }
0x1bff   :  { %v3352_v38 = vpop.permute.xlu0 %3351 }
0x1c00   :  { %4464 = vmatpush3.msra.mxu1 %v3352_v38 }
0x1c01   :  { %4610 = vmatprep.subr.bf16.mxu1 %v4609_v49 }
0x1c02   :  { %v4742_v41 = vpop.eup %4741 }
0x1c03   :  { %v3348_v42 = vmul.f32 %v4742_v41, %v4738_v35  ;;  %v3514_v25 = vpop.permute.xlu0 %3513 }
0x1c04   :  { %v3529_v59 = vsel %vm1677_vm6, %v3527_v57, %v3514_v25  ;;  %v4106_v25 = vld [vmem:[%s5601_s12 + $0x1] ss:$0 sm:$0xff] }
0x1c05   :  { %4466 = vmatmul.mubr.msk.f32.vlgmr.msra.gmra.mrb[44].mxu1 %vm319_vm3, %v3348_v42 }
0x1c06   :  { %v4744_v45 = vpop.eup %4743  ;;  %4612 = vmatpush3.bf16.msra.mxu1 %v4609_v49  ;;  %v4110_v49 = vld [vmem:[%s5600_s13 + $0x48] sm:$0xff] }
0x1c07   :  { %v3350_v47 = vmul.f32 %v4744_v45, %v4740_v33  ;;  %4614 = vmatprep.subr.bf16.mxu1 %v4613_v46  ;;  %v4625_v44 = vpack.c.bf16 %v4110_v49, %v4109_v23  ;;  %v4123_v49 = vld [vmem:[%s5606_s18] ss:$0 sm:$0xff] }
0x1c09   :  { %4471 = vmatmul.mubr.msk.f32.vlgmr.msra.gmra.mrb[30].mxu0 %vm319_vm3, %v3350_v47 }
0x1c0a   :  { %4616 = vmatpush3.bf16.msra.mxu1 %v4613_v46  ;;  %4620 = vmatpush3.bf16.msra.mxu0 %v4617_v27  ;;  %v4112_v46 = vld [vmem:[%s5600_s13 + $0x58] sm:$0xff] }
0x1c0b   :  { %4622 = vmatprep.subr.bf16.mxu0 %v4621_v30  ;;  %4626 = vmatprep.subr.bf16.mxu1 %v4625_v44 }
0x1c0e   :  { %4624 = vmatpush3.bf16.msra.mxu0 %v4621_v30 }
0x1c0f   :  { %4641 = vmatprep.subr.bf16.mxu0 %v4755_v0 }
0x1cd8   :  { %v3423_v50 = vpop.f32.mrb[44].mxu1 }
0x1cd9   :  { %3521 = vrot.lane.b32.xlu0 %v3423_v50, %s5643_s0  ;;  %v4467_v5 = vpop.f32.mrb[45].mxu1  ;;  %v4113_v50 = vld [vmem:[%s5600_s13 + $0x60] sm:$0xff] }
0x1cda   :  { %v4114_v5 = vld [vmem:[%s5600_s13 + $0x68] sm:$0xff] }
0x1cdc   :  { %v3499_v51 = vpop.f32.mrb[30].mxu0 }
0x1cdd   :  { %3523 = vrot.lane.b32.xlu1 %v3499_v51, %s5643_s0  ;;  %v4472_v52 = vpop.f32.mrb[31].mxu0  ;;  %v4633_v51 = vpack.c.bf16 %v4114_v5, %v4113_v50 }
0x1cde   :  { %v4115_v52 = vld [vmem:[%s5600_s13 + $0x70] sm:$0xff] }
0x1cdf   :  { %v4637_v55 = vpack.c.bf16 %v4116_v53, %v4115_v52 }
0x1d4b   :  { %v3522_v60 = vpop.permute.xlu0 %3521 }
0x1d4c   :  { %v3531_v61 = vsel %vm1680_vm5, %v3529_v59, %v3522_v60 }
0x1d4d   :  { %4481 = vmatprep.mubr.msk.f32.mxu1 %vm180_vm1, %v3531_v61 }
0x1d4f   :  { %v3524_v1 = vpop.permute.xlu1 %3523 }
0x1d50   :  { %v3532_v2 = vsel %vm1680_vm5, %v3530_v63, %v3524_v1 }
0x1d51   :  { %4482 = vmatmul.mubr.msk.f32.vlgmr.msra.gmra.mrb[46].mxu1 %vm180_vm1, %v3532_v2 }
0x1d52   :  { %4628 = vmatpush3.bf16.msra.mxu1 %v4625_v44 }
0x1e24   :  { %v4483_v4 = vpop.f32.mrb[46].mxu1 }
0x1e25   :  { %v3624_v6 = vadd.f32 %v4483_v4, %v4094_v54  ;;  %v3618_v7 = vpop.f32.mrb[47].mxu1 }
0x1e26   :  { %v3619_v8 = vadd.f32 %v4094_v54, %v3618_v7 }
0x1e27   :  { %v5492_v9 = vadd.f32 %v3624_v6, %v5271_v39 }
0x1e28   :  { %v5495_v56 = vadd.f32 %v3619_v8, %v5274_v40 }
0x1e29   :  { %v3636_v10 = vsel %vm180_vm1, %v5492_v9, 0.0 }
0x1e2a   :  { %3637 = vadd.xlane.f32.xlu1 %v3636_v10  ;;  %v3633_v11 = vsel %vm180_vm1, %v5495_v56, 0.0 }
0x1e2b   :  { %3634 = vadd.xlane.f32.xlu0 %v3633_v11 }
0x1eb7   :  { %v3638_v12 = vpop.xlane.xlu1 %3637 }
0x1eb8   :  { %v3640_v13 = vmul.f32 0.03125, %v3638_v12  ;;  %v3635_v15 = vpop.xlane.xlu0 %3634 }
0x1eb9   :  { %v3639_v3 = vmul.f32 0.03125, %v3635_v15 }
0x1eba   :  { %v3642_v17 = vsub.f32 %v5492_v9, %v3640_v13 }
0x1ebb   :  { %v3641_v39 = vsub.f32 %v5495_v56, %v3639_v3 }
0x1ebc   :  { %v3644_v19 = vmul.f32 %v3642_v17, %v3642_v17 }
0x1ebd   :  { %v3643_v18 = vmul.f32 %v3641_v39, %v3641_v39 }
0x1ebe   :  { %v3648_v21 = vsel %vm180_vm1, %v3644_v19, 0.0 }
0x1ebf   :  { %v3645_v40 = vsel %vm180_vm1, %v3643_v18, 0.0  ;;  %v4118_v18 = vld [vmem:[%s5602_s14 + $0x1] ss:$0 sm:$0xff] }
0x1ec0   :  { %3646 = vadd.xlane.f32.xlu0 %v3645_v40 }
0x1ec4   :  { %3649 = vadd.xlane.f32.xlu0 %v3648_v21 }
0x1f4d   :  { %v3647_v31 = vpop.xlane.xlu0 %3646 }
0x1f4e   :  { %v3651_v32 = vmul.f32 0.03125, %v3647_v31 }
0x1f50   :  { %v3653_v48 = vadd.f32 1e-12, %v3651_v32 }
0x1f51   :  { %v3650_v43 = vpop.xlane.xlu0 %3649 }
0x1f52   :  { %4745 = vrsqrt.f32 %v3653_v48  ;;  %v3652_v35 = vmul.f32 0.03125, %v3650_v43 }
0x1f54   :  { %v3654_v14 = vadd.f32 1e-12, %v3652_v35 }
0x1f56   :  { %4747 = vrsqrt.f32 %v3654_v14  ;;  %v3922_v14 = vld [vmem:[%s5603_s17] sm:$0xff] }
0x1f5c   :  { %v4746_v33 = vpop.eup %4745 }
0x1f5d   :  { %v3657_v34 = vmul.f32 %v4746_v33, %v3641_v39  ;;  %v3924_v33 = vld [vmem:[%s5603_s17 + $0x10] sm:$0xff] }
0x1f5f   :  { %v3665_v38 = vmul.f32 %v4099_v36, %v3657_v34 }
0x1f60   :  { %v4748_v41 = vpop.eup %4747 }
0x1f61   :  { %v3658_v42 = vmul.f32 %v4748_v41, %v3642_v17  ;;  %v3673_v45 = vadd.f32 %v4100_v37, %v3665_v38 }
0x1f63   :  { %v3666_v47 = vmul.f32 %v4099_v36, %v3658_v42  ;;  %4492 = vmatprep.mubr.msk.f32.mxu0 %vm180_vm1, %v3673_v45  ;;  %v3925_v36 = vld [vmem:[%s5603_s17 + $0x18] sm:$0xff]  ;;  %v4121_v45 = vld [vmem:[%s5604_s15] ss:$0 sm:$0xff] }
0x1f64   :  { %v4645_v34 = vpack.c.bf16 %v3925_v36, %v3924_v33 }
0x1f65   :  { %v3674_v16 = vadd.f32 %v4100_v37, %v3666_v47  ;;  %v4122_v47 = vld [vmem:[%s5605_s16] ss:$0 sm:$0xff] }
0x1f67   :  { %4493 = vmatmul.mubr.msk.f32.vlgmr.msra.gmra.mrb[32].mxu0 %vm180_vm1, %v3674_v16 }
0x1f68   :  { %4522 = vmatprep.mubr.msk.f32.mxu0 %vm4757_vm2, %v4756_v20  ;;  %v4629_v20 = vpack.c.bf16 %v4112_v46, %v4111_v22 }
0x1f6a   :  { %4630 = vmatprep.subr.bf16.mxu1 %v4629_v20 }
0x1f6b   :  { %4632 = vmatpush3.bf16.msra.mxu1 %v4629_v20 }
0x1f6c   :  { %4634 = vmatprep.subr.bf16.mxu1 %v4633_v51 }
0x1f6f   :  { %4636 = vmatpush3.bf16.msra.mxu1 %v4633_v51 }
0x1f70   :  { %4638 = vmatprep.subr.bf16.mxu1 %v4637_v55 }
0x1f73   :  { %4640 = vmatpush3.bf16.msra.mxu1 %v4637_v55 }
0x203a   :  { %v4494_v57 = vpop.f32.mrb[32].mxu0 }
0x203b   :  { %v3766_v58 = vadd.f32 %v4494_v57, %v4106_v25  ;;  %v3760_v59 = vpop.f32.mrb[33].mxu0 }
0x203c   :  { %v3761_v60 = vadd.f32 %v4106_v25, %v3760_v59 }
0x203d   :  { %v3770_v61 = vmul.f32 %v3766_v58, %v3766_v58 }
0x203e   :  { %v3769_v62 = vmul.f32 %v3761_v60, %v3761_v60 }
0x203f   :  { %v3772_v63 = vmul.f32 %v3770_v61, %v3766_v58 }
0x2040   :  { %v3771_v1 = vmul.f32 %v3769_v62, %v3761_v60 }
0x2041   :  { %v3774_v2 = vmul.f32 0.044715, %v3772_v63 }
0x2042   :  { %v3773_v54 = vmul.f32 0.044715, %v3771_v1 }
0x2043   :  { %v3776_v4 = vadd.f32 %v3774_v2, %v3766_v58 }
0x2044   :  { %v3775_v6 = vadd.f32 %v3773_v54, %v3761_v60 }
0x2045   :  { %v3778_v7 = vmul.f32 0.7978846, %v3776_v4 }
0x2046   :  { %v3777_v8 = vmul.f32 0.7978846, %v3775_v6 }
0x2047   :  { %4749 = vtanh.f32 %v3778_v7 }
0x2048   :  { %4751 = vtanh.f32 %v3777_v8 }
0x2051   :  { %v4750_v10 = vpop.eup %4749 }
0x2052   :  { %v4752_v11 = vpop.eup %4751  ;;  %v3782_v12 = vadd.f32 1.0, %v4750_v10 }
0x2053   :  { %v3781_v13 = vadd.f32 1.0, %v4752_v11 }
0x2054   :  { %v3784_v15 = vmul.f32 0.5, %v3782_v12 }
0x2055   :  { %v3783_v3 = vmul.f32 0.5, %v3781_v13 }
0x2056   :  { %v3786_v39 = vmul.f32 %v3784_v15, %v3766_v58 }
0x2057   :  { %v3785_v17 = vmul.f32 %v3783_v3, %v3761_v60 }
0x2059   :  { %4511 = vmatprep.mubr.msk.f32.mxu1 %vm92_vm0, %v3785_v17 }
0x205a   :  { %4512 = vmatmul.mubr.msk.f32.vlgmr.msra.gmra.mrb[48].mxu1 %vm92_vm0, %v3786_v39 }
0x212d   :  { %v4513_v40 = vpop.f32.mrb[48].mxu1 }
0x212e   :  { %v3882_v19 = vadd.f32 %v4513_v40, %v4118_v18  ;;  %v3876_v21 = vpop.f32.mrb[49].mxu1 }
0x212f   :  { %v3877_v24 = vadd.f32 %v4118_v18, %v3876_v21 }
0x2130   :  { %v3886_v26 = vadd.f32 %v3882_v19, %v5492_v9  ;;  %v3923_v9 = vld [vmem:[%s5603_s17 + $0x8] sm:$0xff] }
0x2131   :  { %v3885_v27 = vadd.f32 %v3877_v24, %v5495_v56  ;;  %v4642_v56 = vpack.c.bf16 %v3923_v9, %v3922_v14 }
0x2132   :  { %v3888_v28 = vrot.slane %v3886_v26, 7 }
0x2133   :  { %4643 = vmatpush3.bf16.msra.mxu0 %v4642_v56 }
0x2134   :  { %v3891_v29 = vsel %vm3890_vm7, %v3885_v27, %v3888_v28  ;;  %4644 = vmatprep.subr.bf16.mxu0 %v4755_v0 }
0x2135   :  { %v3895_v30 = vsel %vm3894_vm8, %v3891_v29, 0.0 }
0x2136   :  { %3896 = vadd.xlane.f32.xlu0 %v3895_v30 }
0x2137   :  { %4646 = vmatpush3.bf16.msra.mxu0 %v4645_v34 }
0x21c3   :  { %v3897_v31 = vpop.xlane.xlu0 %3896 }
0x21c4   :  { %v3898_v32 = vmul.f32 0.03125, %v3897_v31 }
0x21c6   :  { %v3899_v48 = vsub.f32 %v3891_v29, %v3898_v32 }
0x21c8   :  { %v3900_v43 = vmul.f32 %v3899_v48, %v3899_v48 }
0x21ca   :  { %v3901_v35 = vsel %vm3894_vm8, %v3900_v43, 0.0 }
0x21cb   :  { %3902 = vadd.xlane.f32.xlu1 %v3901_v35 }
0x2258   :  { %v3903_v37 = vpop.xlane.xlu1 %3902 }
0x2259   :  { %v3904_v38 = vmul.f32 0.03125, %v3903_v37 }
0x225b   :  { %v3905_v41 = vadd.f32 1e-12, %v3904_v38 }
0x225d   :  { %4753 = vrsqrt.f32 %v3905_v41 }
0x2267   :  { %v4754_v42 = vpop.eup %4753 }
0x2268   :  { %v3907_v0 = vmul.f32 %v4754_v42, %v3899_v48 }
0x226a   :  { %v3914_v16 = vmul.f32 %v4121_v45, %v3907_v0 }
0x226c   :  { %v3921_v23 = vadd.f32 %v4122_v47, %v3914_v16 }
0x226e   :  { %4523 = vmatmul.mubr.msk.f32.vlgmr.msra.gmra.mrb[34].mxu0 %vm180_vm1, %v3921_v23 }
0x2341   :  { %v4002_v44 = vpop.f32.mrb[34].mxu0 }
0x2342   :  { %v4003_v22 = vadd.f32 %v4123_v49, %v4002_v44  ;;  %v4524_v46 = vpop.f32.mrb[35].mxu0 }
0x2344   :  { %4006 = vst [vmem:[%s5607_s19] sm:$0x3] %v4003_v22 }

</bundles_post_ra>
